<compile_context>
chip_gen: v5e
topology: v5e:2x2
jax: 0.10.0
libtpu: 0.0.40
codegen_flags: <defaults>
</compile_context>

<pallas_src>
import functools
import math

import jax
import jax.numpy as jnp
from jax import lax
from jax.experimental import pallas as pl
from jax.experimental.pallas import tpu as pltpu


def _fused_mha_kernel(x1_ref, x2_ref, wq_ref, wk_ref, wv_ref,
                      bq_ref, bk_ref, bv_ref, wo_ref, bo_ref,
                      out_ref, attnw_ref, *, num_heads):
    # x1_ref: (L, N, E) f32   x2_ref: (S, N, E) f32
    # w*_ref: (E, E) f32      b*_ref: (1, E) f32
    # out_ref: (L, N, E) f32  attnw_ref: (N, L, S) f32
    L, N, E = x1_ref.shape
    S = x2_ref.shape[0]
    H = num_heads
    D = E // H

    wq = wq_ref[...]
    wk = wk_ref[...]
    wv = wv_ref[...]
    wo = wo_ref[...]
    bq = bq_ref[...]
    bk = bk_ref[...]
    bv = bv_ref[...]
    bo = bo_ref[...]

    # Contract the last (lane) dim of both operands: y = x @ w.T, no transposes.
    cdim = (((1,), (1,)), ((), ()))

    for n in range(N):                       # static unroll (N is tiny)
        x1n = x1_ref[:, n, :]                # (L, E), E lane-dense
        x2n = x2_ref[:, n, :]                # (S, E)

        # Fused in-projections (1/sqrt(D) already folded into wq/bq).
        q = lax.dot_general(x1n, wq, cdim, preferred_element_type=jnp.float32) + bq
        k = lax.dot_general(x2n, wk, cdim, preferred_element_type=jnp.float32) + bk
        v = lax.dot_general(x2n, wv, cdim, preferred_element_type=jnp.float32) + bv

        out_acc = jnp.zeros((L, E), jnp.float32)
        w_acc = jnp.zeros((L, S), jnp.float32)

        for h in range(H):                   # static unroll over heads
            sl = slice(h * D, (h + 1) * D)   # static lane slice
            qh = q[:, sl]                    # (L, D)
            kh = k[:, sl]                    # (S, D)
            vh = v[:, sl]                    # (S, D)

            # Scores (L, S) f32; numerically-stable EXACT softmax (returned
            # as the attention weights -> PyTorch parity).
            s = lax.dot_general(qh, kh, cdim, preferred_element_type=jnp.float32)
            s = s - jnp.max(s, axis=-1, keepdims=True)
            p = jnp.exp(s)
            p = p / jnp.sum(p, axis=-1, keepdims=True)

            # Per-head output (L, D).
            oh = lax.dot_general(p, vh, (((1,), (0,)), ((), ())),
                                 preferred_element_type=jnp.float32)

            # Merge-heads folded into the out-projection:
            #   out += oh @ W_o[:, h*D:(h+1)*D]^T
            out_acc = out_acc + lax.dot_general(
                oh, wo[:, sl], cdim, preferred_element_type=jnp.float32)
            w_acc = w_acc + p

        out_ref[:, n, :] = out_acc + bo            # (L, E) lane-dense store
        attnw_ref[n] = w_acc * (1.0 / H)           # head-averaged weights (L, S)


def _vmem_spec():
    return pl.BlockSpec(memory_space=pltpu.MemorySpace.VMEM)


def fused_mha_pallas(x1, x2, w_q, w_k, w_v, b_q, b_k, b_v, w_o, b_o, num_heads):
    """x1: (L, N, E) f32, x2: (S, N, E) f32 ->
       (attn_output (L, N, E) f32, averaged attn weights (N, L, S) f32)."""
    L, N, E = x1.shape
    S = x2.shape[0]
    out_shapes = (
        jax.ShapeDtypeStruct((L, N, E), jnp.float32),
        jax.ShapeDtypeStruct((N, L, S), jnp.float32),
    )
    # Single grid step: whole arrays (a few KiB each) live in VMEM; no
    # per-step pipeline overhead on v5e/v6e and no tiny-block launch cost.
    return pl.pallas_call(
        functools.partial(_fused_mha_kernel, num_heads=num_heads),
        out_shape=out_shapes,
        in_specs=[_vmem_spec() for _ in range(10)],
        out_specs=(_vmem_spec(), _vmem_spec()),
    )(x1, x2, w_q, w_k, w_v, b_q, b_k, b_v, w_o, b_o)


class MultiheadAttentionPallas:
    """Mimics torch.nn.MultiheadAttention(embed_dim, num_heads) forward with
    query=x1, key=value=x2, need_weights=True, average_attn_weights=True."""

    def __init__(self, embed_dim, num_heads, key):
        assert embed_dim % num_heads == 0
        self.embed_dim = embed_dim
        self.num_heads = num_heads
        self.head_dim = embed_dim // num_heads
        E = embed_dim
        k1, k2 = jax.random.split(key, 2)

        # PyTorch MHA default init scheme (RNG stream differs by construction):
        #   in_proj_weight: xavier_uniform_; in_proj_bias: zeros
        #   out_proj.weight: U(-1/sqrt(E), 1/sqrt(E)); out_proj.bias: zeros
        xav = math.sqrt(6.0 / (E + 3 * E))
        in_proj_weight = jax.random.uniform(k1, (3 * E, E), jnp.float32, -xav, xav)
        in_proj_bias = jnp.zeros((3 * E,), jnp.float32)
        lim_out = 1.0 / math.sqrt(E)
        out_proj_weight = jax.random.uniform(k2, (E, E), jnp.float32,
                                             -lim_out, lim_out)
        out_proj_bias = jnp.zeros((E,), jnp.float32)

        # Pre-split the packed in-projection and fold 1/sqrt(D) into the q
        # projection; keep biases 2-D (1, E) so they broadcast cleanly in VMEM.
        scale = 1.0 / math.sqrt(self.head_dim)
        w_q, w_k, w_v = jnp.split(in_proj_weight, 3, axis=0)
        b_q, b_k, b_v = jnp.split(in_proj_bias, 3, axis=0)
        self.w_q = w_q * scale
        self.w_k = w_k
        self.w_v = w_v
        self.b_q = (b_q * scale).reshape(1, E)
        self.b_k = b_k.reshape(1, E)
        self.b_v = b_v.reshape(1, E)
        self.w_o = out_proj_weight
        self.b_o = out_proj_bias.reshape(1, E)

    def __call__(self, x1, x2):
        # x1: (L, N, E) query ; x2: (S, N, E) key == value
        return fused_mha_pallas(x1, x2, self.w_q, self.w_k, self.w_v,
                                self.b_q, self.b_k, self.b_v,
                                self.w_o, self.b_o, self.num_heads)


if __name__ == "__main__":
    key = jax.random.PRNGKey(0)
    k_params, k_x1, k_x2 = jax.random.split(key, 3)

    # small shapes: L=8 query positions, S=8 key positions, batch N=2,
    # embed_dim E=32, heads H=4 (head_dim 8)
    L, S, N, E, H = 8, 8, 2, 32, 4
    x1 = jax.random.normal(k_x1, (L, N, E), jnp.float32)
    x2 = jax.random.normal(k_x2, (S, N, E), jnp.float32)

    mha = MultiheadAttentionPallas(E, H, k_params)
    attn_out, attn_w = mha(x1, x2)
    jax.block_until_ready(attn_out)
    jax.block_until_ready(attn_w)

    assert attn_out.shape == (L, N, E)
    assert attn_w.shape == (N, L, S)
    # Exact softmax -> weight rows sum to 1 tightly.
    assert jnp.allclose(jnp.sum(attn_w, axis=-1), 1.0, atol=1e-5)

    # Pure-JAX reference of the whole fused path (same pre-folded params).
    D = E // H
    q = jnp.einsum('lne,fe->lnf', x1, mha.w_q,
                   precision=lax.Precision.HIGHEST) + mha.b_q
    k = jnp.einsum('sne,fe->snf', x2, mha.w_k,
                   precision=lax.Precision.HIGHEST) + mha.b_k
    v = jnp.einsum('sne,fe->snf', x2, mha.w_v,
                   precision=lax.Precision.HIGHEST) + mha.b_v
    qh = q.reshape(L, N, H, D).transpose(1, 2, 0, 3)
    kh = k.reshape(S, N, H, D).transpose(1, 2, 0, 3)
    vh = v.reshape(S, N, H, D).transpose(1, 2, 0, 3)
    s = jnp.einsum('nhld,nhsd->nhls', qh, kh, precision=lax.Precision.HIGHEST)
    p = jax.nn.softmax(s, axis=-1)
    o = jnp.einsum('nhls,nhsd->nhld', p, vh, precision=lax.Precision.HIGHEST)
    o = o.transpose(2, 0, 1, 3).reshape(L, N, E)
    ref_out = jnp.einsum('lne,fe->lnf', o, mha.w_o,
                         precision=lax.Precision.HIGHEST) + mha.b_o
    ref_w = jnp.mean(p, axis=1)

    assert jnp.allclose(attn_out, ref_out, atol=2e-2, rtol=2e-2)
    assert jnp.allclose(attn_w, ref_w, atol=2e-2, rtol=2e-2)
    print("KERNEL_OK")
</pallas_src>

<mosaic_0001>
module attributes {stable_mosaic.version = 11 : i64} {
  func.func @_fused_mha_kernel(%arg0: memref<8x2x32xf32, #tpu.memory_space<vmem>>, %arg1: memref<8x2x32xf32, #tpu.memory_space<vmem>>, %arg2: memref<32x32xf32, #tpu.memory_space<vmem>>, %arg3: memref<32x32xf32, #tpu.memory_space<vmem>>, %arg4: memref<32x32xf32, #tpu.memory_space<vmem>>, %arg5: memref<1x32xf32, #tpu.memory_space<vmem>>, %arg6: memref<1x32xf32, #tpu.memory_space<vmem>>, %arg7: memref<1x32xf32, #tpu.memory_space<vmem>>, %arg8: memref<32x32xf32, #tpu.memory_space<vmem>>, %arg9: memref<1x32xf32, #tpu.memory_space<vmem>>, %arg10: memref<8x2x32xf32, #tpu.memory_space<vmem>>, %arg11: memref<2x8x8xf32, #tpu.memory_space<vmem>>) attributes {dimension_semantics = [], scalar_prefetch = 0 : i64, scratch_operands = 0 : i64, tpu.core_type = #tpu.core_type<tc>} {
    %c0 = arith.constant 0 : index
    %c0_0 = arith.constant 0 : index
    %0 = vector.load %arg2[%c0, %c0_0] : memref<32x32xf32, #tpu.memory_space<vmem>>, vector<32x32xf32>
    %c0_1 = arith.constant 0 : index
    %c0_2 = arith.constant 0 : index
    %1 = vector.load %arg3[%c0_1, %c0_2] : memref<32x32xf32, #tpu.memory_space<vmem>>, vector<32x32xf32>
    %c0_3 = arith.constant 0 : index
    %c0_4 = arith.constant 0 : index
    %2 = vector.load %arg4[%c0_3, %c0_4] : memref<32x32xf32, #tpu.memory_space<vmem>>, vector<32x32xf32>
    %c0_5 = arith.constant 0 : index
    %c0_6 = arith.constant 0 : index
    %3 = vector.load %arg8[%c0_5, %c0_6] : memref<32x32xf32, #tpu.memory_space<vmem>>, vector<32x32xf32>
    %c0_7 = arith.constant 0 : index
    %c0_8 = arith.constant 0 : index
    %4 = vector.load %arg5[%c0_7, %c0_8] : memref<1x32xf32, #tpu.memory_space<vmem>>, vector<1x32xf32>
    %c0_9 = arith.constant 0 : index
    %c0_10 = arith.constant 0 : index
    %5 = vector.load %arg6[%c0_9, %c0_10] : memref<1x32xf32, #tpu.memory_space<vmem>>, vector<1x32xf32>
    %c0_11 = arith.constant 0 : index
    %c0_12 = arith.constant 0 : index
    %6 = vector.load %arg7[%c0_11, %c0_12] : memref<1x32xf32, #tpu.memory_space<vmem>>, vector<1x32xf32>
    %c0_13 = arith.constant 0 : index
    %c0_14 = arith.constant 0 : index
    %7 = vector.load %arg9[%c0_13, %c0_14] : memref<1x32xf32, #tpu.memory_space<vmem>>, vector<1x32xf32>
    %c0_15 = arith.constant 0 : index
    %c0_16 = arith.constant 0 : index
    %c0_17 = arith.constant 0 : index
    %8 = vector.load %arg0[%c0_15, %c0_16, %c0_17] : memref<8x2x32xf32, #tpu.memory_space<vmem>>, vector<8x1x32xf32>
    %9 = vector.shape_cast %8 : vector<8x1x32xf32> to vector<8x32xf32>
    %c0_18 = arith.constant 0 : index
    %c0_19 = arith.constant 0 : index
    %c0_20 = arith.constant 0 : index
    %10 = vector.load %arg1[%c0_18, %c0_19, %c0_20] : memref<8x2x32xf32, #tpu.memory_space<vmem>>, vector<8x1x32xf32>
    %11 = vector.shape_cast %10 : vector<8x1x32xf32> to vector<8x32xf32>
    %cst = arith.constant dense<0.000000e+00> : vector<8x32xf32>
    %12 = tpu.matmul %9, %0, %cst {dimension_numbers = #tpu.dot_dimension_numbers<[1], [1], [0], [0], [0, 0, 1, 0], [], []>} : vector<8x32xf32>, vector<32x32xf32>, vector<8x32xf32> -> vector<8x32xf32>
    %13 = vector.broadcast %4 : vector<1x32xf32> to vector<8x32xf32>
    %14 = arith.addf %12, %13 : vector<8x32xf32>
    %cst_21 = arith.constant dense<0.000000e+00> : vector<8x32xf32>
    %15 = tpu.matmul %11, %1, %cst_21 {dimension_numbers = #tpu.dot_dimension_numbers<[1], [1], [0], [0], [0, 0, 1, 0], [], []>} : vector<8x32xf32>, vector<32x32xf32>, vector<8x32xf32> -> vector<8x32xf32>
    %16 = vector.broadcast %5 : vector<1x32xf32> to vector<8x32xf32>
    %17 = arith.addf %15, %16 : vector<8x32xf32>
    %cst_22 = arith.constant dense<0.000000e+00> : vector<8x32xf32>
    %18 = tpu.matmul %11, %2, %cst_22 {dimension_numbers = #tpu.dot_dimension_numbers<[1], [1], [0], [0], [0, 0, 1, 0], [], []>} : vector<8x32xf32>, vector<32x32xf32>, vector<8x32xf32> -> vector<8x32xf32>
    %19 = vector.broadcast %6 : vector<1x32xf32> to vector<8x32xf32>
    %20 = arith.addf %18, %19 : vector<8x32xf32>
    %cst_23 = arith.constant 0.000000e+00 : f32
    %21 = vector.broadcast %cst_23 : f32 to vector<8x32xf32>
    %cst_24 = arith.constant 0.000000e+00 : f32
    %22 = vector.broadcast %cst_24 : f32 to vector<8x8xf32>
    %23 = vector.extract_strided_slice %14 {offsets = [0, 0], sizes = [8, 8], strides = [1, 1]} : vector<8x32xf32> to vector<8x8xf32>
    %24 = vector.extract_strided_slice %17 {offsets = [0, 0], sizes = [8, 8], strides = [1, 1]} : vector<8x32xf32> to vector<8x8xf32>
    %25 = vector.extract_strided_slice %20 {offsets = [0, 0], sizes = [8, 8], strides = [1, 1]} : vector<8x32xf32> to vector<8x8xf32>
    %cst_25 = arith.constant dense<0.000000e+00> : vector<8x8xf32>
    %26 = tpu.matmul %23, %24, %cst_25 {dimension_numbers = #tpu.dot_dimension_numbers<[1], [1], [0], [0], [0, 0, 1, 0], [], []>} : vector<8x8xf32>, vector<8x8xf32>, vector<8x8xf32> -> vector<8x8xf32>
    %cst_26 = arith.constant dense<0xFF800000> : vector<8xf32>
    %27 = vector.multi_reduction <maximumf>, %26, %cst_26 [1] : vector<8x8xf32> to vector<8xf32>
    %28 = vector.shape_cast %27 : vector<8xf32> to vector<8x1xf32>
    %29 = vector.broadcast %28 : vector<8x1xf32> to vector<8x8xf32>
    %30 = arith.subf %26, %29 : vector<8x8xf32>
    %31 = math.exp %30 : vector<8x8xf32>
    %cst_27 = arith.constant dense<0.000000e+00> : vector<8xf32>
    %32 = vector.multi_reduction <add>, %31, %cst_27 [1] : vector<8x8xf32> to vector<8xf32>
    %33 = vector.shape_cast %32 : vector<8xf32> to vector<8x1xf32>
    %34 = vector.broadcast %33 : vector<8x1xf32> to vector<8x8xf32>
    %35 = arith.divf %31, %34 : vector<8x8xf32>
    %cst_28 = arith.constant dense<0.000000e+00> : vector<8x8xf32>
    %36 = tpu.matmul %35, %25, %cst_28 {dimension_numbers = #tpu.dot_dimension_numbers<[1], [0], [0], [1], [0, 0, 1, 1], [], []>} : vector<8x8xf32>, vector<8x8xf32>, vector<8x8xf32> -> vector<8x8xf32>
    %37 = vector.extract_strided_slice %3 {offsets = [0, 0], sizes = [32, 8], strides = [1, 1]} : vector<32x32xf32> to vector<32x8xf32>
    %cst_29 = arith.constant dense<0.000000e+00> : vector<8x32xf32>
    %38 = tpu.matmul %36, %37, %cst_29 {dimension_numbers = #tpu.dot_dimension_numbers<[1], [1], [0], [0], [0, 0, 1, 0], [], []>} : vector<8x8xf32>, vector<32x8xf32>, vector<8x32xf32> -> vector<8x32xf32>
    %39 = arith.addf %21, %38 : vector<8x32xf32>
    %40 = arith.addf %22, %35 : vector<8x8xf32>
    %41 = vector.extract_strided_slice %14 {offsets = [0, 8], sizes = [8, 8], strides = [1, 1]} : vector<8x32xf32> to vector<8x8xf32>
    %42 = vector.extract_strided_slice %17 {offsets = [0, 8], sizes = [8, 8], strides = [1, 1]} : vector<8x32xf32> to vector<8x8xf32>
    %43 = vector.extract_strided_slice %20 {offsets = [0, 8], sizes = [8, 8], strides = [1, 1]} : vector<8x32xf32> to vector<8x8xf32>
    %cst_30 = arith.constant dense<0.000000e+00> : vector<8x8xf32>
    %44 = tpu.matmul %41, %42, %cst_30 {dimension_numbers = #tpu.dot_dimension_numbers<[1], [1], [0], [0], [0, 0, 1, 0], [], []>} : vector<8x8xf32>, vector<8x8xf32>, vector<8x8xf32> -> vector<8x8xf32>
    %cst_31 = arith.constant dense<0xFF800000> : vector<8xf32>
    %45 = vector.multi_reduction <maximumf>, %44, %cst_31 [1] : vector<8x8xf32> to vector<8xf32>
    %46 = vector.shape_cast %45 : vector<8xf32> to vector<8x1xf32>
    %47 = vector.broadcast %46 : vector<8x1xf32> to vector<8x8xf32>
    %48 = arith.subf %44, %47 : vector<8x8xf32>
    %49 = math.exp %48 : vector<8x8xf32>
    %cst_32 = arith.constant dense<0.000000e+00> : vector<8xf32>
    %50 = vector.multi_reduction <add>, %49, %cst_32 [1] : vector<8x8xf32> to vector<8xf32>
    %51 = vector.shape_cast %50 : vector<8xf32> to vector<8x1xf32>
    %52 = vector.broadcast %51 : vector<8x1xf32> to vector<8x8xf32>
    %53 = arith.divf %49, %52 : vector<8x8xf32>
    %cst_33 = arith.constant dense<0.000000e+00> : vector<8x8xf32>
    %54 = tpu.matmul %53, %43, %cst_33 {dimension_numbers = #tpu.dot_dimension_numbers<[1], [0], [0], [1], [0, 0, 1, 1], [], []>} : vector<8x8xf32>, vector<8x8xf32>, vector<8x8xf32> -> vector<8x8xf32>
    %55 = vector.extract_strided_slice %3 {offsets = [0, 8], sizes = [32, 8], strides = [1, 1]} : vector<32x32xf32> to vector<32x8xf32>
    %cst_34 = arith.constant dense<0.000000e+00> : vector<8x32xf32>
    %56 = tpu.matmul %54, %55, %cst_34 {dimension_numbers = #tpu.dot_dimension_numbers<[1], [1], [0], [0], [0, 0, 1, 0], [], []>} : vector<8x8xf32>, vector<32x8xf32>, vector<8x32xf32> -> vector<8x32xf32>
    %57 = arith.addf %39, %56 : vector<8x32xf32>
    %58 = arith.addf %40, %53 : vector<8x8xf32>
    %59 = vector.extract_strided_slice %14 {offsets = [0, 16], sizes = [8, 8], strides = [1, 1]} : vector<8x32xf32> to vector<8x8xf32>
    %60 = vector.extract_strided_slice %17 {offsets = [0, 16], sizes = [8, 8], strides = [1, 1]} : vector<8x32xf32> to vector<8x8xf32>
    %61 = vector.extract_strided_slice %20 {offsets = [0, 16], sizes = [8, 8], strides = [1, 1]} : vector<8x32xf32> to vector<8x8xf32>
    %cst_35 = arith.constant dense<0.000000e+00> : vector<8x8xf32>
    %62 = tpu.matmul %59, %60, %cst_35 {dimension_numbers = #tpu.dot_dimension_numbers<[1], [1], [0], [0], [0, 0, 1, 0], [], []>} : vector<8x8xf32>, vector<8x8xf32>, vector<8x8xf32> -> vector<8x8xf32>
    %cst_36 = arith.constant dense<0xFF800000> : vector<8xf32>
    %63 = vector.multi_reduction <maximumf>, %62, %cst_36 [1] : vector<8x8xf32> to vector<8xf32>
    %64 = vector.shape_cast %63 : vector<8xf32> to vector<8x1xf32>
    %65 = vector.broadcast %64 : vector<8x1xf32> to vector<8x8xf32>
    %66 = arith.subf %62, %65 : vector<8x8xf32>
    %67 = math.exp %66 : vector<8x8xf32>
    %cst_37 = arith.constant dense<0.000000e+00> : vector<8xf32>
    %68 = vector.multi_reduction <add>, %67, %cst_37 [1] : vector<8x8xf32> to vector<8xf32>
    %69 = vector.shape_cast %68 : vector<8xf32> to vector<8x1xf32>
    %70 = vector.broadcast %69 : vector<8x1xf32> to vector<8x8xf32>
    %71 = arith.divf %67, %70 : vector<8x8xf32>
    %cst_38 = arith.constant dense<0.000000e+00> : vector<8x8xf32>
    %72 = tpu.matmul %71, %61, %cst_38 {dimension_numbers = #tpu.dot_dimension_numbers<[1], [0], [0], [1], [0, 0, 1, 1], [], []>} : vector<8x8xf32>, vector<8x8xf32>, vector<8x8xf32> -> vector<8x8xf32>
    %73 = vector.extract_strided_slice %3 {offsets = [0, 16], sizes = [32, 8], strides = [1, 1]} : vector<32x32xf32> to vector<32x8xf32>
    %cst_39 = arith.constant dense<0.000000e+00> : vector<8x32xf32>
    %74 = tpu.matmul %72, %73, %cst_39 {dimension_numbers = #tpu.dot_dimension_numbers<[1], [1], [0], [0], [0, 0, 1, 0], [], []>} : vector<8x8xf32>, vector<32x8xf32>, vector<8x32xf32> -> vector<8x32xf32>
    %75 = arith.addf %57, %74 : vector<8x32xf32>
    %76 = arith.addf %58, %71 : vector<8x8xf32>
    %77 = vector.extract_strided_slice %14 {offsets = [0, 24], sizes = [8, 8], strides = [1, 1]} : vector<8x32xf32> to vector<8x8xf32>
    %78 = vector.extract_strided_slice %17 {offsets = [0, 24], sizes = [8, 8], strides = [1, 1]} : vector<8x32xf32> to vector<8x8xf32>
    %79 = vector.extract_strided_slice %20 {offsets = [0, 24], sizes = [8, 8], strides = [1, 1]} : vector<8x32xf32> to vector<8x8xf32>
    %cst_40 = arith.constant dense<0.000000e+00> : vector<8x8xf32>
    %80 = tpu.matmul %77, %78, %cst_40 {dimension_numbers = #tpu.dot_dimension_numbers<[1], [1], [0], [0], [0, 0, 1, 0], [], []>} : vector<8x8xf32>, vector<8x8xf32>, vector<8x8xf32> -> vector<8x8xf32>
    %cst_41 = arith.constant dense<0xFF800000> : vector<8xf32>
    %81 = vector.multi_reduction <maximumf>, %80, %cst_41 [1] : vector<8x8xf32> to vector<8xf32>
    %82 = vector.shape_cast %81 : vector<8xf32> to vector<8x1xf32>
    %83 = vector.broadcast %82 : vector<8x1xf32> to vector<8x8xf32>
    %84 = arith.subf %80, %83 : vector<8x8xf32>
    %85 = math.exp %84 : vector<8x8xf32>
    %cst_42 = arith.constant dense<0.000000e+00> : vector<8xf32>
    %86 = vector.multi_reduction <add>, %85, %cst_42 [1] : vector<8x8xf32> to vector<8xf32>
    %87 = vector.shape_cast %86 : vector<8xf32> to vector<8x1xf32>
    %88 = vector.broadcast %87 : vector<8x1xf32> to vector<8x8xf32>
    %89 = arith.divf %85, %88 : vector<8x8xf32>
    %cst_43 = arith.constant dense<0.000000e+00> : vector<8x8xf32>
    %90 = tpu.matmul %89, %79, %cst_43 {dimension_numbers = #tpu.dot_dimension_numbers<[1], [0], [0], [1], [0, 0, 1, 1], [], []>} : vector<8x8xf32>, vector<8x8xf32>, vector<8x8xf32> -> vector<8x8xf32>
    %91 = vector.extract_strided_slice %3 {offsets = [0, 24], sizes = [32, 8], strides = [1, 1]} : vector<32x32xf32> to vector<32x8xf32>
    %cst_44 = arith.constant dense<0.000000e+00> : vector<8x32xf32>
    %92 = tpu.matmul %90, %91, %cst_44 {dimension_numbers = #tpu.dot_dimension_numbers<[1], [1], [0], [0], [0, 0, 1, 0], [], []>} : vector<8x8xf32>, vector<32x8xf32>, vector<8x32xf32> -> vector<8x32xf32>
    %93 = arith.addf %75, %92 : vector<8x32xf32>
    %94 = arith.addf %76, %89 : vector<8x8xf32>
    %95 = vector.broadcast %7 : vector<1x32xf32> to vector<8x32xf32>
    %96 = arith.addf %93, %95 : vector<8x32xf32>
    %c0_45 = arith.constant 0 : index
    %c0_46 = arith.constant 0 : index
    %c0_47 = arith.constant 0 : index
    %97 = vector.load %arg10[%c0_45, %c0_46, %c0_47] : memref<8x2x32xf32, #tpu.memory_space<vmem>>, vector<8x1x32xf32>
    %98 = vector.shape_cast %97 : vector<8x1x32xf32> to vector<8x32xf32>
    %99 = vector.shape_cast %96 : vector<8x32xf32> to vector<8x1x32xf32>
    tpu.vector_store %arg10[%c0_45, %c0_46, %c0_47], %99 {strides = array<i32>} : memref<8x2x32xf32, #tpu.memory_space<vmem>>, vector<8x1x32xf32>,
    %cst_48 = arith.constant 2.500000e-01 : f32
    %100 = vector.broadcast %cst_48 : f32 to vector<8x8xf32>
    %101 = arith.mulf %94, %100 : vector<8x8xf32>
    %c0_49 = arith.constant 0 : index
    %c0_50 = arith.constant 0 : index
    %c0_51 = arith.constant 0 : index
    %102 = vector.load %arg11[%c0_49, %c0_50, %c0_51] : memref<2x8x8xf32, #tpu.memory_space<vmem>>, vector<1x8x8xf32>
    %103 = vector.shape_cast %102 : vector<1x8x8xf32> to vector<8x8xf32>
    %104 = vector.shape_cast %101 : vector<8x8xf32> to vector<1x8x8xf32>
    tpu.vector_store %arg11[%c0_49, %c0_50, %c0_51], %104 {strides = array<i32>} : memref<2x8x8xf32, #tpu.memory_space<vmem>>, vector<1x8x8xf32>,
    %c0_52 = arith.constant 0 : index
    %c1 = arith.constant 1 : index
    %c0_53 = arith.constant 0 : index
    %105 = vector.load %arg0[%c0_52, %c1, %c0_53] : memref<8x2x32xf32, #tpu.memory_space<vmem>>, vector<8x1x32xf32>
    %106 = vector.shape_cast %105 : vector<8x1x32xf32> to vector<8x32xf32>
    %c0_54 = arith.constant 0 : index
    %c1_55 = arith.constant 1 : index
    %c0_56 = arith.constant 0 : index
    %107 = vector.load %arg1[%c0_54, %c1_55, %c0_56] : memref<8x2x32xf32, #tpu.memory_space<vmem>>, vector<8x1x32xf32>
    %108 = vector.shape_cast %107 : vector<8x1x32xf32> to vector<8x32xf32>
    %cst_57 = arith.constant dense<0.000000e+00> : vector<8x32xf32>
    %109 = tpu.matmul %106, %0, %cst_57 {dimension_numbers = #tpu.dot_dimension_numbers<[1], [1], [0], [0], [0, 0, 1, 0], [], []>} : vector<8x32xf32>, vector<32x32xf32>, vector<8x32xf32> -> vector<8x32xf32>
    %110 = vector.broadcast %4 : vector<1x32xf32> to vector<8x32xf32>
    %111 = arith.addf %109, %110 : vector<8x32xf32>
    %cst_58 = arith.constant dense<0.000000e+00> : vector<8x32xf32>
    %112 = tpu.matmul %108, %1, %cst_58 {dimension_numbers = #tpu.dot_dimension_numbers<[1], [1], [0], [0], [0, 0, 1, 0], [], []>} : vector<8x32xf32>, vector<32x32xf32>, vector<8x32xf32> -> vector<8x32xf32>
    %113 = vector.broadcast %5 : vector<1x32xf32> to vector<8x32xf32>
    %114 = arith.addf %112, %113 : vector<8x32xf32>
    %cst_59 = arith.constant dense<0.000000e+00> : vector<8x32xf32>
    %115 = tpu.matmul %108, %2, %cst_59 {dimension_numbers = #tpu.dot_dimension_numbers<[1], [1], [0], [0], [0, 0, 1, 0], [], []>} : vector<8x32xf32>, vector<32x32xf32>, vector<8x32xf32> -> vector<8x32xf32>
    %116 = vector.broadcast %6 : vector<1x32xf32> to vector<8x32xf32>
    %117 = arith.addf %115, %116 : vector<8x32xf32>
    %cst_60 = arith.constant 0.000000e+00 : f32
    %118 = vector.broadcast %cst_60 : f32 to vector<8x32xf32>
    %cst_61 = arith.constant 0.000000e+00 : f32
    %119 = vector.broadcast %cst_61 : f32 to vector<8x8xf32>
    %120 = vector.extract_strided_slice %111 {offsets = [0, 0], sizes = [8, 8], strides = [1, 1]} : vector<8x32xf32> to vector<8x8xf32>
    %121 = vector.extract_strided_slice %114 {offsets = [0, 0], sizes = [8, 8], strides = [1, 1]} : vector<8x32xf32> to vector<8x8xf32>
    %122 = vector.extract_strided_slice %117 {offsets = [0, 0], sizes = [8, 8], strides = [1, 1]} : vector<8x32xf32> to vector<8x8xf32>
    %cst_62 = arith.constant dense<0.000000e+00> : vector<8x8xf32>
    %123 = tpu.matmul %120, %121, %cst_62 {dimension_numbers = #tpu.dot_dimension_numbers<[1], [1], [0], [0], [0, 0, 1, 0], [], []>} : vector<8x8xf32>, vector<8x8xf32>, vector<8x8xf32> -> vector<8x8xf32>
    %cst_63 = arith.constant dense<0xFF800000> : vector<8xf32>
    %124 = vector.multi_reduction <maximumf>, %123, %cst_63 [1] : vector<8x8xf32> to vector<8xf32>
    %125 = vector.shape_cast %124 : vector<8xf32> to vector<8x1xf32>
    %126 = vector.broadcast %125 : vector<8x1xf32> to vector<8x8xf32>
    %127 = arith.subf %123, %126 : vector<8x8xf32>
    %128 = math.exp %127 : vector<8x8xf32>
    %cst_64 = arith.constant dense<0.000000e+00> : vector<8xf32>
    %129 = vector.multi_reduction <add>, %128, %cst_64 [1] : vector<8x8xf32> to vector<8xf32>
    %130 = vector.shape_cast %129 : vector<8xf32> to vector<8x1xf32>
    %131 = vector.broadcast %130 : vector<8x1xf32> to vector<8x8xf32>
    %132 = arith.divf %128, %131 : vector<8x8xf32>
    %cst_65 = arith.constant dense<0.000000e+00> : vector<8x8xf32>
    %133 = tpu.matmul %132, %122, %cst_65 {dimension_numbers = #tpu.dot_dimension_numbers<[1], [0], [0], [1], [0, 0, 1, 1], [], []>} : vector<8x8xf32>, vector<8x8xf32>, vector<8x8xf32> -> vector<8x8xf32>
    %134 = vector.extract_strided_slice %3 {offsets = [0, 0], sizes = [32, 8], strides = [1, 1]} : vector<32x32xf32> to vector<32x8xf32>
    %cst_66 = arith.constant dense<0.000000e+00> : vector<8x32xf32>
    %135 = tpu.matmul %133, %134, %cst_66 {dimension_numbers = #tpu.dot_dimension_numbers<[1], [1], [0], [0], [0, 0, 1, 0], [], []>} : vector<8x8xf32>, vector<32x8xf32>, vector<8x32xf32> -> vector<8x32xf32>
    %136 = arith.addf %118, %135 : vector<8x32xf32>
    %137 = arith.addf %119, %132 : vector<8x8xf32>
    %138 = vector.extract_strided_slice %111 {offsets = [0, 8], sizes = [8, 8], strides = [1, 1]} : vector<8x32xf32> to vector<8x8xf32>
    %139 = vector.extract_strided_slice %114 {offsets = [0, 8], sizes = [8, 8], strides = [1, 1]} : vector<8x32xf32> to vector<8x8xf32>
    %140 = vector.extract_strided_slice %117 {offsets = [0, 8], sizes = [8, 8], strides = [1, 1]} : vector<8x32xf32> to vector<8x8xf32>
    %cst_67 = arith.constant dense<0.000000e+00> : vector<8x8xf32>
    %141 = tpu.matmul %138, %139, %cst_67 {dimension_numbers = #tpu.dot_dimension_numbers<[1], [1], [0], [0], [0, 0, 1, 0], [], []>} : vector<8x8xf32>, vector<8x8xf32>, vector<8x8xf32> -> vector<8x8xf32>
    %cst_68 = arith.constant dense<0xFF800000> : vector<8xf32>
    %142 = vector.multi_reduction <maximumf>, %141, %cst_68 [1] : vector<8x8xf32> to vector<8xf32>
    %143 = vector.shape_cast %142 : vector<8xf32> to vector<8x1xf32>
    %144 = vector.broadcast %143 : vector<8x1xf32> to vector<8x8xf32>
    %145 = arith.subf %141, %144 : vector<8x8xf32>
    %146 = math.exp %145 : vector<8x8xf32>
    %cst_69 = arith.constant dense<0.000000e+00> : vector<8xf32>
    %147 = vector.multi_reduction <add>, %146, %cst_69 [1] : vector<8x8xf32> to vector<8xf32>
    %148 = vector.shape_cast %147 : vector<8xf32> to vector<8x1xf32>
    %149 = vector.broadcast %148 : vector<8x1xf32> to vector<8x8xf32>
    %150 = arith.divf %146, %149 : vector<8x8xf32>
    %cst_70 = arith.constant dense<0.000000e+00> : vector<8x8xf32>
    %151 = tpu.matmul %150, %140, %cst_70 {dimension_numbers = #tpu.dot_dimension_numbers<[1], [0], [0], [1], [0, 0, 1, 1], [], []>} : vector<8x8xf32>, vector<8x8xf32>, vector<8x8xf32> -> vector<8x8xf32>
    %152 = vector.extract_strided_slice %3 {offsets = [0, 8], sizes = [32, 8], strides = [1, 1]} : vector<32x32xf32> to vector<32x8xf32>
    %cst_71 = arith.constant dense<0.000000e+00> : vector<8x32xf32>
    %153 = tpu.matmul %151, %152, %cst_71 {dimension_numbers = #tpu.dot_dimension_numbers<[1], [1], [0], [0], [0, 0, 1, 0], [], []>} : vector<8x8xf32>, vector<32x8xf32>, vector<8x32xf32> -> vector<8x32xf32>
    %154 = arith.addf %136, %153 : vector<8x32xf32>
    %155 = arith.addf %137, %150 : vector<8x8xf32>
    %156 = vector.extract_strided_slice %111 {offsets = [0, 16], sizes = [8, 8], strides = [1, 1]} : vector<8x32xf32> to vector<8x8xf32>
    %157 = vector.extract_strided_slice %114 {offsets = [0, 16], sizes = [8, 8], strides = [1, 1]} : vector<8x32xf32> to vector<8x8xf32>
    %158 = vector.extract_strided_slice %117 {offsets = [0, 16], sizes = [8, 8], strides = [1, 1]} : vector<8x32xf32> to vector<8x8xf32>
    %cst_72 = arith.constant dense<0.000000e+00> : vector<8x8xf32>
    %159 = tpu.matmul %156, %157, %cst_72 {dimension_numbers = #tpu.dot_dimension_numbers<[1], [1], [0], [0], [0, 0, 1, 0], [], []>} : vector<8x8xf32>, vector<8x8xf32>, vector<8x8xf32> -> vector<8x8xf32>
    %cst_73 = arith.constant dense<0xFF800000> : vector<8xf32>
    %160 = vector.multi_reduction <maximumf>, %159, %cst_73 [1] : vector<8x8xf32> to vector<8xf32>
    %161 = vector.shape_cast %160 : vector<8xf32> to vector<8x1xf32>
    %162 = vector.broadcast %161 : vector<8x1xf32> to vector<8x8xf32>
    %163 = arith.subf %159, %162 : vector<8x8xf32>
    %164 = math.exp %163 : vector<8x8xf32>
    %cst_74 = arith.constant dense<0.000000e+00> : vector<8xf32>
    %165 = vector.multi_reduction <add>, %164, %cst_74 [1] : vector<8x8xf32> to vector<8xf32>
    %166 = vector.shape_cast %165 : vector<8xf32> to vector<8x1xf32>
    %167 = vector.broadcast %166 : vector<8x1xf32> to vector<8x8xf32>
    %168 = arith.divf %164, %167 : vector<8x8xf32>
    %cst_75 = arith.constant dense<0.000000e+00> : vector<8x8xf32>
    %169 = tpu.matmul %168, %158, %cst_75 {dimension_numbers = #tpu.dot_dimension_numbers<[1], [0], [0], [1], [0, 0, 1, 1], [], []>} : vector<8x8xf32>, vector<8x8xf32>, vector<8x8xf32> -> vector<8x8xf32>
    %170 = vector.extract_strided_slice %3 {offsets = [0, 16], sizes = [32, 8], strides = [1, 1]} : vector<32x32xf32> to vector<32x8xf32>
    %cst_76 = arith.constant dense<0.000000e+00> : vector<8x32xf32>
    %171 = tpu.matmul %169, %170, %cst_76 {dimension_numbers = #tpu.dot_dimension_numbers<[1], [1], [0], [0], [0, 0, 1, 0], [], []>} : vector<8x8xf32>, vector<32x8xf32>, vector<8x32xf32> -> vector<8x32xf32>
    %172 = arith.addf %154, %171 : vector<8x32xf32>
    %173 = arith.addf %155, %168 : vector<8x8xf32>
    %174 = vector.extract_strided_slice %111 {offsets = [0, 24], sizes = [8, 8], strides = [1, 1]} : vector<8x32xf32> to vector<8x8xf32>
    %175 = vector.extract_strided_slice %114 {offsets = [0, 24], sizes = [8, 8], strides = [1, 1]} : vector<8x32xf32> to vector<8x8xf32>
    %176 = vector.extract_strided_slice %117 {offsets = [0, 24], sizes = [8, 8], strides = [1, 1]} : vector<8x32xf32> to vector<8x8xf32>
    %cst_77 = arith.constant dense<0.000000e+00> : vector<8x8xf32>
    %177 = tpu.matmul %174, %175, %cst_77 {dimension_numbers = #tpu.dot_dimension_numbers<[1], [1], [0], [0], [0, 0, 1, 0], [], []>} : vector<8x8xf32>, vector<8x8xf32>, vector<8x8xf32> -> vector<8x8xf32>
    %cst_78 = arith.constant dense<0xFF800000> : vector<8xf32>
    %178 = vector.multi_reduction <maximumf>, %177, %cst_78 [1] : vector<8x8xf32> to vector<8xf32>
    %179 = vector.shape_cast %178 : vector<8xf32> to vector<8x1xf32>
    %180 = vector.broadcast %179 : vector<8x1xf32> to vector<8x8xf32>
    %181 = arith.subf %177, %180 : vector<8x8xf32>
    %182 = math.exp %181 : vector<8x8xf32>
    %cst_79 = arith.constant dense<0.000000e+00> : vector<8xf32>
    %183 = vector.multi_reduction <add>, %182, %cst_79 [1] : vector<8x8xf32> to vector<8xf32>
    %184 = vector.shape_cast %183 : vector<8xf32> to vector<8x1xf32>
    %185 = vector.broadcast %184 : vector<8x1xf32> to vector<8x8xf32>
    %186 = arith.divf %182, %185 : vector<8x8xf32>
    %cst_80 = arith.constant dense<0.000000e+00> : vector<8x8xf32>
    %187 = tpu.matmul %186, %176, %cst_80 {dimension_numbers = #tpu.dot_dimension_numbers<[1], [0], [0], [1], [0, 0, 1, 1], [], []>} : vector<8x8xf32>, vector<8x8xf32>, vector<8x8xf32> -> vector<8x8xf32>
    %188 = vector.extract_strided_slice %3 {offsets = [0, 24], sizes = [32, 8], strides = [1, 1]} : vector<32x32xf32> to vector<32x8xf32>
    %cst_81 = arith.constant dense<0.000000e+00> : vector<8x32xf32>
    %189 = tpu.matmul %187, %188, %cst_81 {dimension_numbers = #tpu.dot_dimension_numbers<[1], [1], [0], [0], [0, 0, 1, 0], [], []>} : vector<8x8xf32>, vector<32x8xf32>, vector<8x32xf32> -> vector<8x32xf32>
    %190 = arith.addf %172, %189 : vector<8x32xf32>
    %191 = arith.addf %173, %186 : vector<8x8xf32>
    %192 = vector.broadcast %7 : vector<1x32xf32> to vector<8x32xf32>
    %193 = arith.addf %190, %192 : vector<8x32xf32>
    %c0_82 = arith.constant 0 : index
    %c1_83 = arith.constant 1 : index
    %c0_84 = arith.constant 0 : index
    %194 = vector.load %arg10[%c0_82, %c1_83, %c0_84] : memref<8x2x32xf32, #tpu.memory_space<vmem>>, vector<8x1x32xf32>
    %195 = vector.shape_cast %194 : vector<8x1x32xf32> to vector<8x32xf32>
    %196 = vector.shape_cast %193 : vector<8x32xf32> to vector<8x1x32xf32>
    tpu.vector_store %arg10[%c0_82, %c1_83, %c0_84], %196 {strides = array<i32>} : memref<8x2x32xf32, #tpu.memory_space<vmem>>, vector<8x1x32xf32>,
    %cst_85 = arith.constant 2.500000e-01 : f32
    %197 = vector.broadcast %cst_85 : f32 to vector<8x8xf32>
    %198 = arith.mulf %191, %197 : vector<8x8xf32>
    %c1_86 = arith.constant 1 : index
    %c0_87 = arith.constant 0 : index
    %c0_88 = arith.constant 0 : index
    %199 = vector.load %arg11[%c1_86, %c0_87, %c0_88] : memref<2x8x8xf32, #tpu.memory_space<vmem>>, vector<1x8x8xf32>
    %200 = vector.shape_cast %199 : vector<1x8x8xf32> to vector<8x8xf32>
    %201 = vector.shape_cast %198 : vector<8x8xf32> to vector<1x8x8xf32>
    tpu.vector_store %arg11[%c1_86, %c0_87, %c0_88], %201 {strides = array<i32>} : memref<2x8x8xf32, #tpu.memory_space<vmem>>, vector<1x8x8xf32>,
    return
  }
}

</mosaic_0001>

<bundles_post_ra>
// kernel: tpu_custom_call.1
= control target key start
LH: loop header
LB: loop body
LE: loop exit
PB: predicated region body
PF: predicated region fallthrough
CT: control target
= control target key end

     0   :  { %17 = vsyncpa [#allocation3], 0  ;;  %s2286_s0 = inlined_call_operand.hbm [shape: f32[8,2,32], index: 0, kind: input, shape index: {}]   ;;  %s2287_s1 = inlined_call_operand.hbm [shape: f32[8,2,32], index: 1, kind: input, shape index: {}]   ;;  %s2288_s2 = inlined_call_operand.hbm [shape: f32[32,32], index: 2, kind: input, shape index: {}]   ;;  %s2289_s3 = inlined_call_operand.hbm [shape: f32[32,32], index: 3, kind: input, shape index: {}]   ;;  %s2290_s4 = inlined_call_operand.hbm [shape: f32[32,32], index: 4, kind: input, shape index: {}]   ;;  %s2291_s5 = inlined_call_operand.vmem [shape: f32[1,32], index: 5, kind: input, shape index: {}]   ;;  %s2292_s6 = inlined_call_operand.vmem [shape: f32[1,32], index: 6, kind: input, shape index: {}]   ;;  %s2293_s7 = inlined_call_operand.vmem [shape: f32[1,32], index: 7, kind: input, shape index: {}]   ;;  %s2294_s8 = inlined_call_operand.hbm [shape: f32[32,32], index: 8, kind: input, shape index: {}]   ;;  %s2295_s9 = inlined_call_operand.vmem [shape: f32[1,32], index: 9, kind: input, shape index: {}]   ;;  %s2296_s10 = inlined_call_operand.hbm [shape: f32[8,2,32], index: 10, kind: output, shape index: {0}]   ;;  %s2297_s11 = inlined_call_operand.hbm [shape: f32[2,8,8], index: 11, kind: output, shape index: {1}]  }
   0x1   :  { %18 = vsyncpa [#allocation6], 0 }
   0x2   :  { %19 = vsyncpa [#allocation9], 0 }
   0x3   :  { %20 = vsyncpa [#allocation12], 0 }
   0x4   :  { %21 = vsyncpa [#allocation4], 0 }
   0x5   :  { %22 = vsyncpa [#allocation15], 0  ;;  %s40_s19 = sshll.u32 %s2287_s1, 4  ;;  %s1773_s20 = smov [#allocation5]   ;;  %s41_s19 = int_to_ptr.hbm [resolvable:$true] %s40_s19 }
   0x6   :  { %s42_s21 = sshll.u32 %s1773_s20, 4  ;;  %s1774_s22 = smov 32   ;;  %s43_s21 = int_to_ptr.vmem [resolvable:$true] %s42_s21 }
   0x7   :  { %s1775_s23 = smov 2   ;;  %s66_s26 = sshll.u32 %s2289_s3, 4  ;;  %s67_s26 = int_to_ptr.hbm [resolvable:$true] %s66_s26 }
   0x8   :  { %48 = dma.hbm_to_vmem [thread:$0]  %s41_s19, 256, %s43_s21, [#allocation6], %s1774_s22, %s1774_s22, %s1775_s23  }
   0x9   :  { %s1776_s27 = smov [#allocation8]   ;;  %s27_s1 = sshll.u32 %s2286_s0, 4  ;;  %s28_s1 = int_to_ptr.hbm [resolvable:$true] %s27_s1 }
   0xa   :  { %s68_s28 = sshll.u32 %s1776_s27, 4  ;;  %s1777_s12 = smov 128   ;;  %s69_s28 = int_to_ptr.vmem [resolvable:$true] %s68_s28 }
   0xb   :  { %s1778_s13 = smov 8   ;;  %s53_s16 = sshll.u32 %s2288_s2, 4  ;;  %s54_s16 = int_to_ptr.hbm [resolvable:$true] %s53_s16 }
   0xc   :  { %74 = dma.hbm_to_vmem [thread:$0]  %s67_s26, 512, %s69_s28, [#allocation9], %s1777_s12, %s1777_s12, %s1778_s13  }
   0xd   :  { %s1779_s3 = smov [#allocation2]   ;;  %s1780_s0 = smov [#allocation7]  }
   0xe   :  { %s29_s17 = sshll.u32 %s1779_s3, 4  ;;  %s55_s18 = sshll.u32 %s1780_s0, 4  ;;  %s30_s17 = int_to_ptr.vmem [resolvable:$true] %s29_s17  ;;  %s56_s18 = int_to_ptr.vmem [resolvable:$true] %s55_s18 }
   0xf   :  { %35 = dma.hbm_to_vmem [thread:$0]  %s28_s1, 256, %s30_s17, [#allocation3], %s1774_s22, %s1774_s22, %s1775_s23  }
  0x10   :  { %s79_s21 = sshll.u32 %s2290_s4, 4  ;;  %s98_s25 = sshll.u32 %s2294_s8, 4  ;;  %s80_s21 = int_to_ptr.hbm [resolvable:$true] %s79_s21  ;;  %s99_s25 = int_to_ptr.hbm [resolvable:$true] %s98_s25 }
  0x11   :  { %61 = dma.hbm_to_vmem [thread:$0]  %s54_s16, 512, %s56_s18, [#allocation6], %s1777_s12, %s1777_s12, %s1778_s13  }
  0x12   :  { %s1781_s26 = smov [#allocation10]   ;;  %s1782_s28 = smov [#allocation11]  }
  0x13   :  { %s81_s27 = sshll.u32 %s1781_s26, 4  ;;  %s100_s4 = sshll.u32 %s1782_s28, 4  ;;  %s82_s27 = int_to_ptr.vmem [resolvable:$true] %s81_s27  ;;  %s101_s4 = int_to_ptr.vmem [resolvable:$true] %s100_s4 }
  0x14   :  { %87 = dma.hbm_to_vmem [thread:$0]  %s80_s21, 512, %s82_s27, [#allocation9], %s1777_s12, %s1777_s12, %s1778_s13  }
  0x15   :  { %106 = dma.hbm_to_vmem [thread:$0]  %s99_s25, 512, %s101_s4, [#allocation12], %s1777_s12, %s1777_s12, %s1778_s13  }
  0x16   :  { %1761 = dma.done.wait [#allocation3], 256  }
  0x17   :  { %1762 = vsyncadd [#allocation3], 4294967040 }
  0x18   :  { %1763 = dma.done.wait [#allocation6], 768  }
  0x19   :  { %1764 = vsyncadd [#allocation6], 4294966528 }
  0x1a   :  { %1765 = dma.done.wait [#allocation9], 1024  }
  0x1b   :  { %1766 = vsyncadd [#allocation9], 4294966272 }
  0x1c   :  { %1767 = dma.done.wait [#allocation12], 512  }
  0x1d   :  { %1768 = vsyncadd [#allocation12], 4294966784  ;;  %vm201_vm0 = vcmask 261120   ;;  %v1884_v0 = vld [vmem:[#allocation8 + $0x18] sm:$0xff]  ;;  %v1894_v3 = vld [vmem:[#allocation8 + $0x10] sm:$0xff]  ;;  %vm181_vm1 = vcmask 1041409  }
  0x1e   :  { %v1886_v1 = vld [vmem:[#allocation7 + $0x18] sm:$0xff]  ;;  %1429 = vmatpush.xpose.msk.msra.mxu1 %vm201_vm0, %v1884_v0  ;;  %v1896_v4 = vld [vmem:[#allocation7 + $0x10] sm:$0xff]  ;;  %vm184_vm2 = vcmask 1042434   ;;  %vm187_vm3 = vcmask 1043459   ;;  %vm190_vm4 = vcmask 1044484   ;;  %vm193_vm5 = vcmask 1045509  }
  0x1f   :  { %1424 = vmatpush.xpose.msk.msra.mxu0 %vm201_vm0, %v1886_v1  ;;  %v1892_v2 = vld [vmem:[#allocation10 + $0x18] sm:$0xff]  ;;  %v1900_v5 = vld [vmem:[#allocation10 + $0x10] sm:$0xff]  ;;  %vm196_vm6 = vcmask 1046534   ;;  %v1902_v7 = vld [vmem:[#allocation8 + $0x8] sm:$0xff]  ;;  %vm2298_vm7 = vcmask 1047559   ;;  %vm330_vm8 = vcmask 64512  }
  0x20   :  { %1434 = vmatpush.xpose.msk.msra.mxu2 %vm201_vm0, %v1892_v2  ;;  %v162_v6 = vld [vmem:[#allocation5 + $0x2] sm:$0x1]  ;;  %v1904_v8 = vld [vmem:[#allocation7 + $0x8] sm:$0xff]  ;;  %v163_v9 = vld [vmem:[#allocation5 + $0x4] sm:$0x1]  ;;  %s1783_s14 = smov 112  }
  0x21   :  { %v164_v10 = vld [vmem:[#allocation5 + $0x6] sm:$0x1]  ;;  %v165_v11 = vld [vmem:[#allocation5 + $0x8] sm:$0x1]  ;;  %v161_v12 = vld [vmem:[#allocation5] sm:$0x1] }
  0x22   :  { %1430 = vmatpush.xpose.msk.msra.mxu1 %vm201_vm0, %v1894_v3  ;;  %v166_v13 = vld [vmem:[#allocation5 + $0xa] sm:$0x1]  ;;  %v167_v14 = vld [vmem:[#allocation5 + $0xc] sm:$0x1]  ;;  %v168_v15 = vld [vmem:[#allocation5 + $0xe] sm:$0x1] }
  0x23   :  { %1425 = vmatpush.xpose.msk.msra.mxu0 %vm201_vm0, %v1896_v4  ;;  %v247_v16 = vrot.slane %v162_v6, 7  ;;  %v249_v17 = vrot.slane %v163_v9, 6  ;;  %v251_v18 = vrot.slane %v164_v10, 5  ;;  %v253_v19 = vrot.slane %v165_v11, 4  ;;  %v153_v21 = vld [vmem:[#allocation2] sm:$0x1] }
  0x24   :  { %1435 = vmatpush.xpose.msk.msra.mxu2 %vm201_vm0, %v1900_v5  ;;  %v255_v20 = vrot.slane %v166_v13, 3  ;;  %v154_v22 = vld [vmem:[#allocation2 + $0x2] sm:$0x1]  ;;  %v1912_v23 = vld [vmem:[#allocation10 + $0x8] sm:$0xff]  ;;  %v155_v26 = vld [vmem:[#allocation2 + $0x4] sm:$0x1] }
  0x25   :  { %v1914_v24 = vld [vmem:[#allocation8] sm:$0xff]  ;;  %v248_v25 = vsel %vm181_vm1, %v247_v16, %v161_v12  ;;  %v157_v28 = vld [vmem:[#allocation2 + $0x8] sm:$0x1]  ;;  %v257_v30 = vrot.slane %v167_v14, 2  ;;  %v259_v31 = vrot.slane %v168_v15, 1  ;;  %v180_v36 = vrot.slane %v154_v22, 7 }
  0x26   :  { %v156_v27 = vld [vmem:[#allocation2 + $0x6] sm:$0x1]  ;;  %1431 = vmatpush.xpose.msk.msra.mxu1 %vm201_vm0, %v1902_v7  ;;  %v250_v29 = vsel %vm184_vm2, %v249_v17, %v248_v25  ;;  %v158_v32 = vld [vmem:[#allocation2 + $0xa] sm:$0x1]  ;;  %v159_v33 = vld [vmem:[#allocation2 + $0xc] sm:$0x1] }
  0x27   :  { %1426 = vmatpush.xpose.msk.msra.mxu0 %vm201_vm0, %v1904_v8  ;;  %v1922_v34 = vld [vmem:[#allocation7] sm:$0xff]  ;;  %v252_v35 = vsel %vm187_vm3, %v251_v18, %v250_v29  ;;  %v183_v37 = vrot.slane %v155_v26, 6  ;;  %v186_v38 = vrot.slane %v156_v27, 5  ;;  %v160_v40 = vld [vmem:[#allocation2 + $0xe] sm:$0x1]  ;;  %v189_v41 = vrot.slane %v157_v28, 4 }
  0x28   :  { %1436 = vmatpush.xpose.msk.msra.mxu2 %vm201_vm0, %v1912_v23  ;;  %v254_v39 = vsel %vm190_vm4, %v253_v19, %v252_v35  ;;  %v1928_v42 = vld [vmem:[#allocation10] sm:$0xff]  ;;  %v182_v44 = vsel %vm181_vm1, %v180_v36, %v153_v21  ;;  %v192_v45 = vrot.slane %v158_v32, 3  ;;  %v195_v48 = vrot.slane %v159_v33, 2  ;;  %s1784_s15 = smov 120   ;;  %s1785_s16 = smov 104  }
  0x29   :  { %v256_v43 = vsel %vm193_vm5, %v255_v20, %v254_v39  ;;  %v185_v47 = vsel %vm184_vm2, %v183_v37, %v182_v44  ;;  %v198_v51 = vrot.slane %v160_v40, 1  ;;  %v1952_v56 = vld [vmem:[%s2292_s6] ss:$0 sm:$0xff]  ;;  %s1403_s19 = sshll.u32 %s2297_s11, 4  ;;  %s1787_s11 = smov [#allocation13]   ;;  %s1404_s19 = int_to_ptr.hbm [resolvable:$true] %s1403_s19 }
  0x2a   :  { %1432 = vmatpush.xpose.msk.msra.mxu1 %vm201_vm0, %v1914_v24  ;;  %v258_v46 = vsel %vm196_vm6, %v257_v30, %v256_v43  ;;  %v188_v50 = vsel %vm187_vm3, %v186_v38, %v185_v47  ;;  %v1957_v58 = vld [vmem:[%s2291_s5] ss:$0 sm:$0xff]  ;;  %s1390_s21 = sshll.u32 %s2296_s10, 4  ;;  %s1391_s21 = int_to_ptr.hbm [resolvable:$true] %s1390_s21 }
  0x2b   :  { %1427 = vmatpush.xpose.msk.msra.mxu0 %vm201_vm0, %v1922_v34  ;;  %v260_v49 = vsel %vm2298_vm7, %v259_v31, %v258_v46  ;;  %v191_v52 = vsel %vm190_vm4, %v189_v41, %v188_v50  ;;  %v1972_v62 = vld [vmem:[%s2293_s7] ss:$0 sm:$0xff] }
  0x2c   :  { %1437 = vmatpush.xpose.msk.msra.mxu2 %vm201_vm0, %v1928_v42  ;;  %v194_v53 = vsel %vm193_vm5, %v192_v45, %v191_v52 }
  0x2d   :  { %1433 = vmatmul.msk.f32.vlgmr.msra.gmra.mxu1 %vm201_vm0, %v260_v49  ;;  %v197_v54 = vsel %vm196_vm6, %v195_v48, %v194_v53 }
  0x2e   :  { %v200_v55 = vsel %vm2298_vm7, %v198_v51, %v197_v54 }
  0x2f   :  { %1438 = vmatmul.msk.f32.vlgmr.msra.gmra.mxu2 %vm201_vm0, %v260_v49  ;;  %1428 = vmatmul.msk.f32.vlgmr.msra.gmra.mxu0 %vm201_vm0, %v200_v55  ;;  %v2007_v55 = vld [vmem:[#allocation11 + $0x10] sm:$0xff] }
  0xaa   :  { %v292_v57 = vpop.f32.mrf.mxu1 }
  0xab   :  { %v1960_v59 = vadd.f32 %v1952_v56, %v292_v57 }
  0xac   :  { %v233_v60 = vpop.f32.mrf.mxu0 }
  0xad   :  { %561 = vrot.lane.b32.xlu2 %v1960_v59, %s1783_s14  ;;  %407 = vrot.lane.b32.xlu1 %v1960_v59, %s1784_s15  ;;  %v234_v61 = vadd.f32 %v1957_v58, %v233_v60 }
  0xae   :  { %1439 = vmatpush.xpose.msk.msra.mxu3 %vm330_vm8, %v1960_v59 }
  0xb1   :  { %1440 = vmatmul.msk.f32.vlgmr.msra.gmra.mxu3 %vm330_vm8, %v234_v61 }
  0xb2   :  { %v327_v63 = vpop.f32.mrf.mxu2 }
  0xb3   :  { %v1976_v6 = vadd.f32 %v1972_v62, %v327_v63 }
  0xb5   :  { %399 = vmatpush.msrb.mxu3 %v1976_v6  ;;  %559 = vrot.lane.b32.xlu2 %v234_v61, %s1783_s14 }
  0xb6   :  { %405 = vrot.lane.b32.xlu1 %v234_v61, %s1784_s15 }
  0xbd   :  { %611 = vrot.lane.b32.xlu2 %v1976_v6, %s1783_s14 }
  0xc5   :  { %678 = vrot.lane.b32.xlu2 %v234_v61, %s1785_s16 }
 0x107   :  { %v562_v9 = vpop.permute.xlu2 %561 }
 0x10f   :  { %v560_v10 = vpop.permute.xlu2 %559 }
 0x117   :  { %v612_v11 = vpop.permute.xlu2 %611 }
 0x118   :  { %632 = vmatpush.msrb.mxu0 %v612_v11 }
 0x11f   :  { %v408_v12 = vpop.permute.xlu1 %407  ;;  %v2000_v41 = vpop.permute.xlu2 %678 }
 0x120   :  { %1442 = vmatpush.xpose.msk.msra.mxu3 %vm330_vm8, %v408_v12 }
 0x128   :  { %v406_v35 = vpop.permute.xlu1 %405 }
 0x134   :  { %v354_v13 = vpop.f32.mrf.mxu3 }
 0x135   :  { %v357_v14 = vsel %vm330_vm8, %v354_v13, -inf }
 0x136   :  { %358 = vmax.xlane.f32.xlu0 %v357_v14 }
 0x1a9   :  { %v359_v15 = vpop.xlane.xlu0 %358 }
 0x1aa   :  { %v360_v16 = vsub.f32 %v354_v13, %v359_v15 }
 0x1ac   :  { %v361_v17 = vmul.f32 1.442695, %v360_v16 }
 0x1ae   :  { %1537 = vpow2.f32 %v361_v17 }
 0x1b4   :  { %v1538_v18 = vpop.eup %1537 }
 0x1b5   :  { %v363_v19 = vsel %vm330_vm8, %v1538_v18, 0.0 }
 0x1b6   :  { %364 = vadd.xlane.f32.xlu0 %v363_v19 }
 0x229   :  { %v365_v20 = vpop.xlane.xlu0 %364 }
 0x22a   :  { %1539 = vrcp.f32 %v365_v20  ;;  %v377_v26 = vand.u32 2147483648, %v365_v20  ;;  %v375_v28 = vand.u32 2147483647, %v365_v20  ;;  %vm371_vm10 = vweird.f32 %v365_v20 }
 0x22c   :  { %v378_v30 = vor.u32 1.1754944e-38, %v377_v26  ;;  %vm376_vm12 = vcmp.eq.f32.partialorder %v375_v28, 8.507059e+37 }
 0x230   :  { %v1540_v21 = vpop.eup %1539 }
 0x231   :  { %v367_v22 = vmul.f32 %v1540_v21, %v365_v20  ;;  %vm372_vm9 = vweird.f32 %v1540_v21 }
 0x232   :  { %vm373_vm11 = vmor %vm371_vm10, %vm372_vm9 }
 0x233   :  { %v368_v25 = vsub.f32 1.0, %v367_v22 }
 0x235   :  { %v369_v27 = vmul.f32 %v1540_v21, %v368_v25 }
 0x237   :  { %v370_v29 = vadd.f32 %v1540_v21, %v369_v27 }
 0x239   :  { %v374_v31 = vsel %vm373_vm11, %v1540_v21, %v370_v29 }
 0x23a   :  { %v379_v32 = vsel %vm376_vm12, %v378_v30, %v374_v31 }
 0x23b   :  { %v1987_v33 = vmul.f32 %v1538_v18, %v379_v32 }
 0x23d   :  { %1441 = vmatmul.msk.f32.vlgmr.msrb.gmra.mxu3 %vm330_vm8, %v1987_v33 }
 0x23e   :  { %1455 = vmatpush.xpose.msk.msrb.mxu3 %vm330_vm8, %v562_v9  ;;  %v2011_v9 = vld [vmem:[#allocation11] sm:$0xff] }
 0x245   :  { %1443 = vmatmul.msk.f32.vlgmr.msra.gmra.mxu3 %vm330_vm8, %v406_v35  ;;  %v2021_v35 = vld [vmem:[#allocation11 + $0x18] sm:$0xff] }
 0x24d   :  { %1456 = vmatmul.msk.f32.vlgmr.msrb.gmra.mxu3 %vm330_vm8, %v560_v10 }
 0x2c0   :  { %v1994_v36 = vpop.f32.mrf.mxu3 }
 0x2c8   :  { %v430_v37 = vpop.f32.mrf.mxu3 }
 0x2c9   :  { %v433_v38 = vsel %vm330_vm8, %v430_v37, -inf }
 0x2ca   :  { %434 = vmax.xlane.f32.xlu2 %v433_v38 }
 0x2d0   :  { %v584_v39 = vpop.f32.mrf.mxu3 }
 0x2d1   :  { %v587_v40 = vsel %vm330_vm8, %v584_v39, -inf }
 0x2d2   :  { %588 = vmax.xlane.f32.xlu0 %v587_v40 }
 0x2e6   :  { %680 = vrot.lane.b32.xlu0 %v1960_v59, %s1785_s16 }
 0x33d   :  { %v435_v43 = vpop.xlane.xlu2 %434 }
 0x33e   :  { %v436_v44 = vsub.f32 %v430_v37, %v435_v43 }
 0x340   :  { %v437_v45 = vmul.f32 1.442695, %v436_v44 }
 0x342   :  { %1541 = vpow2.f32 %v437_v45 }
 0x345   :  { %v589_v46 = vpop.xlane.xlu0 %588 }
 0x346   :  { %v590_v47 = vsub.f32 %v584_v39, %v589_v46  ;;  %v828_v46 = vld [vmem:[#allocation2 + $0x3] sm:$0x1] }
 0x348   :  { %v1542_v48 = vpop.eup %1541  ;;  %v591_v49 = vmul.f32 1.442695, %v590_v47  ;;  %v829_v47 = vld [vmem:[#allocation2 + $0x5] sm:$0x1] }
 0x349   :  { %v439_v50 = vsel %vm330_vm8, %v1542_v48, 0.0 }
 0x34a   :  { %1543 = vpow2.f32 %v591_v49  ;;  %440 = vadd.xlane.f32.xlu0 %v439_v50  ;;  %v830_v49 = vld [vmem:[#allocation2 + $0x7] sm:$0x1]  ;;  %v831_v50 = vld [vmem:[#allocation2 + $0x9] sm:$0x1] }
 0x350   :  { %v1544_v51 = vpop.eup %1543 }
 0x351   :  { %v593_v52 = vsel %vm330_vm8, %v1544_v51, 0.0 }
 0x352   :  { %594 = vadd.xlane.f32.xlu1 %v593_v52  ;;  %v851_v52 = vrot.slane %v828_v46, 7 }
 0x358   :  { %v681_v53 = vpop.permute.xlu0 %680 }
 0x359   :  { %1463 = vmatpush.xpose.msk.msra.mxu0 %vm330_vm8, %v681_v53  ;;  %v853_v53 = vrot.slane %v829_v47, 6 }
 0x35e   :  { %492 = vrot.lane.b32.xlu0 %v2007_v55, %s1784_s15 }
 0x366   :  { %488 = vrot.lane.b32.xlu0 %v2011_v9, %s1784_s15 }
 0x36b   :  { %458 = vrot.lane.b32.xlu1 %v1976_v6, %s1784_s15 }
 0x3bd   :  { %v441_v54 = vpop.xlane.xlu0 %440 }
 0x3be   :  { %1545 = vrcp.f32 %v441_v54  ;;  %v453_v10 = vand.u32 2147483648, %v441_v54  ;;  %vm447_vm14 = vweird.f32 %v441_v54  ;;  %v451_v12 = vand.u32 2147483647, %v441_v54 }
 0x3c0   :  { %v454_v16 = vor.u32 1.1754944e-38, %v453_v10  ;;  %vm452_vm9 = vcmp.eq.f32.partialorder %v451_v12, 8.507059e+37  ;;  %v837_v10 = vld [vmem:[#allocation5 + $0x5] sm:$0x1] }
 0x3c4   :  { %v1546_v57 = vpop.eup %1545 }
 0x3c5   :  { %v443_v59 = vmul.f32 %v1546_v57, %v441_v54  ;;  %v595_v60 = vpop.xlane.xlu1 %594  ;;  %vm448_vm13 = vweird.f32 %v1546_v57  ;;  %v833_v54 = vld [vmem:[#allocation2 + $0xd] sm:$0x1] }
 0x3c6   :  { %1547 = vrcp.f32 %v595_v60  ;;  %vm449_vm15 = vmor %vm447_vm14, %vm448_vm13  ;;  %v607_v18 = vand.u32 2147483648, %v595_v60  ;;  %v605_v21 = vand.u32 2147483647, %v595_v60  ;;  %vm601_vm11 = vweird.f32 %v595_v60 }
 0x3c7   :  { %v444_v61 = vsub.f32 1.0, %v443_v59  ;;  %v836_v59 = vld [vmem:[#allocation5 + $0x3] sm:$0x1] }
 0x3c8   :  { %v608_v26 = vor.u32 1.1754944e-38, %v607_v18  ;;  %vm606_vm7 = vcmp.eq.f32.partialorder %v605_v21, 8.507059e+37  ;;  %v897_v18 = vrot.slane %v837_v10, 6 }
 0x3c9   :  { %v445_v63 = vmul.f32 %v1546_v57, %v444_v61  ;;  %v857_v61 = vrot.slane %v831_v50, 4  ;;  %v842_v50 = vld [vmem:[#allocation5 + $0xf] sm:$0x1] }
 0x3cb   :  { %v446_v11 = vadd.f32 %v1546_v57, %v445_v63  ;;  %v861_v63 = vrot.slane %v833_v54, 2  ;;  %v907_v54 = vrot.slane %v842_v50, 1 }
 0x3cc   :  { %v1548_v13 = vpop.eup %1547 }
 0x3cd   :  { %v597_v14 = vmul.f32 %v1548_v13, %v595_v60  ;;  %v450_v15 = vsel %vm449_vm15, %v1546_v57, %v446_v11  ;;  %vm602_vm10 = vweird.f32 %v1548_v13  ;;  %v855_v57 = vrot.slane %v830_v49, 5  ;;  %v834_v60 = vld [vmem:[#allocation2 + $0xf] sm:$0x1] }
 0x3ce   :  { %v455_v19 = vsel %vm452_vm9, %v454_v16, %v450_v15  ;;  %vm603_vm12 = vmor %vm601_vm11, %vm602_vm10  ;;  %v895_v11 = vrot.slane %v836_v59, 7 }
 0x3cf   :  { %v598_v17 = vsub.f32 1.0, %v597_v14  ;;  %v456_v25 = vmul.f32 %v1542_v48, %v455_v19  ;;  %v827_v48 = vld [vmem:[#allocation2 + $0x1] sm:$0x1]  ;;  %v835_v14 = vld [vmem:[#allocation5 + $0x1] sm:$0x1] }
 0x3d0   :  { %v2055_v39 = vpop.permute.xlu0 %492  ;;  %v896_v21 = vsel %vm181_vm1, %v895_v11, %v835_v14 }
 0x3d1   :  { %v599_v20 = vmul.f32 %v1548_v13, %v598_v17  ;;  %v558_v30 = vadd.f32 %v456_v25, %v1987_v33  ;;  %v838_v17 = vld [vmem:[#allocation5 + $0x7] sm:$0x1] }
 0x3d3   :  { %v600_v22 = vadd.f32 %v1548_v13, %v599_v20 }
 0x3d5   :  { %v604_v27 = vsel %vm603_vm12, %v1548_v13, %v600_v22  ;;  %v863_v13 = vrot.slane %v834_v60, 1 }
 0x3d6   :  { %v609_v28 = vsel %vm606_vm7, %v608_v26, %v604_v27  ;;  %vm2299_vm7 = vcmask 1047559   ;;  %v839_v26 = vld [vmem:[#allocation5 + $0x9] sm:$0x1]  ;;  %v899_v27 = vrot.slane %v838_v17, 5 }
 0x3d7   :  { %v610_v29 = vmul.f32 %v1544_v51, %v609_v28  ;;  %v832_v51 = vld [vmem:[#allocation2 + $0xb] sm:$0x1] }
 0x3d8   :  { %v2069_v43 = vpop.permute.xlu0 %488 }
 0x3d9   :  { %1457 = vmatmul.msk.f32.vlgmr.msrb.gmra.mxu0 %vm330_vm8, %v610_v29  ;;  %v2017_v31 = vadd.f32 %v610_v29, %v558_v30  ;;  %v898_v29 = vsel %vm184_vm2, %v897_v18, %v896_v21 }
 0x3da   :  { %1471 = vmatpush.xpose.msk.msrb.mxu0 %vm201_vm0, %v1886_v1  ;;  %v2034_v1 = vld [vmem:[#allocation11 + $0x8] sm:$0xff] }
 0x3dd   :  { %v459_v32 = vpop.permute.xlu1 %458 }
 0x3de   :  { %479 = vmatpush.msrb.mxu2 %v459_v32  ;;  %1472 = vmatpush.xpose.msk.msrb.mxu0 %vm201_vm0, %v1896_v4 }
 0x3df   :  { %1444 = vmatmul.msk.f32.vlgmr.msrb.gmra.mxu2 %vm330_vm8, %v456_v25 }
 0x3e0   :  { %1450 = vmatpush.xpose.msk.msra.mxu2 %vm330_vm8, %v2021_v35 }
 0x3e1   :  { %1464 = vmatmul.msk.f32.vlgmr.msra.gmra.mxu0 %vm330_vm8, %v2000_v41 }
 0x3e2   :  { %1473 = vmatpush.xpose.msk.msrb.mxu0 %vm201_vm0, %v1904_v8 }
 0x3e4   :  { %1451 = vmatpush.xpose.msk.msra.mxu2 %vm330_vm8, %v2007_v55 }
 0x3e6   :  { %1474 = vmatpush.xpose.msk.msrb.mxu0 %vm201_vm0, %v1922_v34 }
 0x3e8   :  { %1452 = vmatpush.xpose.msk.msra.mxu2 %vm330_vm8, %v2034_v1 }
 0x3ec   :  { %1453 = vmatpush.xpose.msk.msra.mxu2 %vm330_vm8, %v2011_v9 }
 0x3ef   :  { %1454 = vmatmul.msk.f32.vlgmr.msra.gmra.mxu2 %vm330_vm8, %v1994_v36 }
 0x456   :  { %v2044_v4 = vpop.f32.mrf.mxu0 }
 0x45e   :  { %v703_v8 = vpop.f32.mrf.mxu0 }
 0x45f   :  { %v706_v33 = vsel %vm330_vm8, %v703_v8, -inf }
 0x460   :  { %707 = vmax.xlane.f32.xlu2 %v706_v33  ;;  %v840_v33 = vld [vmem:[#allocation5 + $0xb] sm:$0x1] }
 0x462   :  { %v481_v44 = vpop.f32.mrf.mxu2 }
 0x478   :  { %494 = vrot.lane.b32.xlu2 %v2021_v35, %s1784_s15 }
 0x480   :  { %490 = vrot.lane.b32.xlu2 %v2034_v1, %s1784_s15 }
 0x488   :  { %730 = vrot.lane.b32.xlu2 %v1976_v6, %s1785_s16 }
 0x4d3   :  { %v708_v34 = vpop.xlane.xlu2 %707 }
 0x4d4   :  { %v709_v37 = vsub.f32 %v703_v8, %v708_v34  ;;  %v901_v34 = vrot.slane %v839_v26, 4 }
 0x4d6   :  { %v710_v38 = vmul.f32 1.442695, %v709_v37  ;;  %v900_v37 = vsel %vm187_vm3, %v899_v27, %v898_v29  ;;  %v555_v27 = vpop.f32.mrf.mxu2 }
 0x4d7   :  { %v902_v47 = vsel %vm190_vm4, %v901_v34, %v900_v37 }
 0x4d8   :  { %1549 = vpow2.f32 %v710_v38 }
 0x4db   :  { %v2053_v36 = vpop.permute.xlu2 %494 }
 0x4dc   :  { %1445 = vmatpush.xpose.msk.msrb.mxu1 %vm330_vm8, %v2053_v36 }
 0x4de   :  { %v2059_v40 = vpop.eup %1549 }
 0x4df   :  { %v712_v41 = vsel %vm330_vm8, %v2059_v40, 0.0 }
 0x4e0   :  { %713 = vadd.xlane.f32.xlu1 %v712_v41  ;;  %1446 = vmatpush.xpose.msk.msrb.mxu1 %vm330_vm8, %v2055_v39 }
 0x4e3   :  { %v2065_v6 = vpop.permute.xlu2 %490 }
 0x4e4   :  { %1447 = vmatpush.xpose.msk.msrb.mxu1 %vm330_vm8, %v2065_v6 }
 0x4e8   :  { %1448 = vmatpush.xpose.msk.msrb.mxu1 %vm330_vm8, %v2069_v43 }
 0x4eb   :  { %1449 = vmatmul.msk.f32.vlgmr.msrb.gmra.mxu1 %vm330_vm8, %v481_v44  ;;  %v731_v45 = vpop.permute.xlu2 %730  ;;  %v841_v44 = vld [vmem:[#allocation5 + $0xd] sm:$0x1] }
 0x4ec   :  { %751 = vmatpush.msra.mxu1 %v731_v45  ;;  %v903_v45 = vrot.slane %v840_v33, 3 }
 0x4ee   :  { %1476 = vmatpush.xpose.msk.msrb.mxu1 %vm201_vm0, %v1884_v0 }
 0x4f2   :  { %1477 = vmatpush.xpose.msk.msrb.mxu1 %vm201_vm0, %v1894_v3  ;;  %v852_v3 = vsel %vm181_vm1, %v851_v52, %v827_v48  ;;  %v904_v52 = vsel %vm193_vm5, %v903_v45, %v902_v47 }
 0x4f6   :  { %1478 = vmatpush.xpose.msk.msrb.mxu1 %vm201_vm0, %v1902_v7  ;;  %v859_v7 = vrot.slane %v832_v51, 3  ;;  %v905_v51 = vrot.slane %v841_v44, 2 }
 0x4fa   :  { %1479 = vmatpush.xpose.msk.msrb.mxu1 %vm201_vm0, %v1914_v24  ;;  %v854_v24 = vsel %vm184_vm2, %v853_v53, %v852_v3  ;;  %vm2300_vm2 = vmmov %vm2299_vm7 }
 0x4fb   :  { %v856_v12 = vsel %vm187_vm3, %v855_v57, %v854_v24  ;;  %v906_v57 = vsel %vm196_vm6, %v905_v51, %v904_v52 }
 0x4fc   :  { %v858_v15 = vsel %vm190_vm4, %v857_v61, %v856_v12  ;;  %v908_v59 = vsel %vm2300_vm2, %v907_v54, %v906_v57 }
 0x4fd   :  { %v860_v16 = vsel %vm193_vm5, %v859_v7, %v858_v15 }
 0x4fe   :  { %v862_v19 = vsel %vm196_vm6, %v861_v63, %v860_v16  ;;  %vm816_vm6 = vcmask 253952  }
 0x4ff   :  { %v864_v22 = vsel %vm2299_vm7, %v863_v13, %v862_v19 }
 0x500   :  { %1475 = vmatmul.msk.f32.vlgmr.msrb.gmra.mxu0 %vm201_vm0, %v864_v22 }
 0x553   :  { %v714_v0 = vpop.xlane.xlu1 %713 }
 0x554   :  { %1551 = vrcp.f32 %v714_v0  ;;  %v726_v30 = vand.u32 2147483648, %v714_v0  ;;  %v724_v8 = vand.u32 2147483647, %v714_v0  ;;  %vm720_vm1 = vweird.f32 %v714_v0 }
 0x556   :  { %v727_v41 = vor.u32 1.1754944e-38, %v726_v30  ;;  %vm725_vm15 = vcmp.eq.f32.partialorder %v724_v8, 8.507059e+37 }
 0x55a   :  { %v1552_v20 = vpop.eup %1551 }
 0x55b   :  { %v716_v25 = vmul.f32 %v1552_v20, %v714_v0  ;;  %vm721_vm13 = vweird.f32 %v1552_v20 }
 0x55c   :  { %vm722_vm14 = vmor %vm720_vm1, %vm721_vm13 }
 0x55d   :  { %v717_v28 = vsub.f32 1.0, %v716_v25 }
 0x55f   :  { %v718_v32 = vmul.f32 %v1552_v20, %v717_v28 }
 0x561   :  { %v719_v38 = vadd.f32 %v1552_v20, %v718_v32 }
 0x563   :  { %v723_v46 = vsel %vm722_vm14, %v1552_v20, %v719_v38 }
 0x564   :  { %v728_v48 = vsel %vm725_vm15, %v727_v41, %v723_v46  ;;  %v2220_v41 = vld [vmem:[%s2295_s9] ss:$0 sm:$0xff]  ;;  %s1786_s9 = smov [#allocation14]  }
 0x565   :  { %v729_v49 = vmul.f32 %v2059_v40, %v728_v48  ;;  %s1401_s17 = sshll.u32 %s1786_s9, 4  ;;  %s1402_s17 = int_to_ptr.vmem [resolvable:$true] %s1401_s17 }
 0x567   :  { %1465 = vmatmul.msk.f32.vlgmr.msra.gmra.mxu1 %vm330_vm8, %v729_v49  ;;  %v796_v53 = vadd.f32 %v729_v49, %v2017_v31 }
 0x568   :  { %v2109_v31 = vpop.f32.mrf.mxu1 }
 0x569   :  { %v825_v0 = vmul.f32 0.25, %v796_v53  ;;  %v556_v8 = vadd.f32 %v555_v27, %v2109_v31 }
 0x56b   :  { %826 = vst.msk [vmem:[#allocation14] sm:$0xff] %vm330_vm8, %v825_v0 }
 0x56f   :  { %1480 = vmatmul.msk.f32.vlgmr.msrb.gmra.mxu1 %vm201_vm0, %v908_v59 }
 0x57d   :  { %v884_v60 = vpop.f32.mrf.mxu0 }
 0x57e   :  { %v2103_v40 = vadd.f32 %v1957_v58, %v884_v60 }
 0x580   :  { %1151 = vrot.lane.b32.xlu1 %v2103_v40, %s1783_s14  ;;  %1025 = vrot.lane.b32.xlu2 %v2103_v40, %s1784_s15 }
 0x588   :  { %643 = vrot.lane.b32.xlu2 %v2021_v35, %s1783_s14  ;;  %762 = vrot.lane.b32.xlu1 %v2021_v35, %s1785_s16 }
 0x590   :  { %639 = vrot.lane.b32.xlu2 %v2034_v1, %s1783_s14  ;;  %760 = vrot.lane.b32.xlu1 %v2007_v55, %s1785_s16 }
 0x598   :  { %758 = vrot.lane.b32.xlu1 %v2034_v1, %s1785_s16 }
 0x5da   :  { %v1026_v7 = vpop.permute.xlu2 %1025 }
 0x5e2   :  { %v644_v24 = vpop.permute.xlu2 %643 }
 0x5e3   :  { %1458 = vmatpush.xpose.msk.msra.mxu3 %vm330_vm8, %v644_v24 }
 0x5e4   :  { %v2115_v3 = vpop.f32.mrf.mxu1 }
 0x5ea   :  { %v640_v12 = vpop.permute.xlu2 %639 }
 0x5ec   :  { %v928_v58 = vpop.f32.mrf.mxu1 }
 0x5ed   :  { %v2122_v61 = vadd.f32 %v1952_v56, %v928_v58 }
 0x5ef   :  { %1027 = vrot.lane.b32.xlu0 %v2122_v61, %s1784_s15 }
 0x5f2   :  { %v1152_v10 = vpop.permute.xlu1 %1151 }
 0x5f7   :  { %1153 = vrot.lane.b32.xlu0 %v2122_v61, %s1783_s14 }
 0x5ff   :  { %641 = vrot.lane.b32.xlu0 %v2007_v55, %s1783_s14 }
 0x607   :  { %637 = vrot.lane.b32.xlu0 %v2011_v9, %s1783_s14 }
 0x661   :  { %v1028_v56 = vpop.permute.xlu0 %1027 }
 0x662   :  { %1489 = vmatpush.xpose.msk.msra.mxu1 %vm330_vm8, %v1028_v56 }
 0x665   :  { %1490 = vmatmul.msk.f32.vlgmr.msra.gmra.mxu1 %vm330_vm8, %v1026_v7 }
 0x669   :  { %v1154_v63 = vpop.permute.xlu0 %1153 }
 0x66a   :  { %1502 = vmatpush.xpose.msk.msrb.mxu1 %vm330_vm8, %v1154_v63 }
 0x66d   :  { %1503 = vmatmul.msk.f32.vlgmr.msrb.gmra.mxu1 %vm330_vm8, %v1152_v10 }
 0x66e   :  { %1505 = vmatpush.xpose.msk.msra.mxu1 %vm330_vm8, %v644_v24 }
 0x671   :  { %v642_v11 = vpop.permute.xlu0 %641 }
 0x672   :  { %1459 = vmatpush.xpose.msk.msra.mxu3 %vm330_vm8, %v642_v11  ;;  %1506 = vmatpush.xpose.msk.msra.mxu1 %vm330_vm8, %v642_v11 }
 0x676   :  { %1460 = vmatpush.xpose.msk.msra.mxu3 %vm330_vm8, %v640_v12  ;;  %1507 = vmatpush.xpose.msk.msra.mxu1 %vm330_vm8, %v640_v12 }
 0x679   :  { %v638_v13 = vpop.permute.xlu0 %637 }
 0x67a   :  { %1461 = vmatpush.xpose.msk.msra.mxu3 %vm330_vm8, %v638_v13  ;;  %1508 = vmatpush.xpose.msk.msra.mxu1 %vm330_vm8, %v638_v13 }
 0x67d   :  { %1462 = vmatmul.msk.f32.vlgmr.msra.gmra.mxu3 %vm330_vm8, %v2044_v4  ;;  %v2167_v4 = vpop.permute.xlu1 %762 }
 0x67e   :  { %1481 = vmatpush.xpose.msk.msrb.mxu3 %vm201_vm0, %v1892_v2  ;;  %1466 = vmatpush.xpose.msk.msrb.mxu2 %vm330_vm8, %v2167_v4 }
 0x682   :  { %1482 = vmatpush.xpose.msk.msrb.mxu3 %vm201_vm0, %v1900_v5 }
 0x686   :  { %1483 = vmatpush.xpose.msk.msrb.mxu3 %vm201_vm0, %v1912_v23 }
 0x68a   :  { %1484 = vmatpush.xpose.msk.msrb.mxu3 %vm201_vm0, %v1928_v42 }
 0x68d   :  { %1485 = vmatmul.msk.f32.vlgmr.msrb.gmra.mxu3 %vm201_vm0, %v908_v59 }
 0x68e   :  { %1492 = vmatpush.xpose.msk.msra.mxu3 %vm330_vm8, %v2053_v36  ;;  %v2171_v36 = vpop.permute.xlu1 %760 }
 0x68f   :  { %1467 = vmatpush.xpose.msk.msrb.mxu2 %vm330_vm8, %v2171_v36 }
 0x692   :  { %1493 = vmatpush.xpose.msk.msra.mxu3 %vm330_vm8, %v2055_v39 }
 0x696   :  { %1494 = vmatpush.xpose.msk.msra.mxu3 %vm330_vm8, %v2065_v6 }
 0x69a   :  { %1495 = vmatpush.xpose.msk.msra.mxu3 %vm330_vm8, %v2069_v43 }
 0x6e2   :  { %v1050_v2 = vpop.f32.mrf.mxu1 }
 0x6e3   :  { %v1053_v5 = vsel %vm330_vm8, %v1050_v2, -inf }
 0x6e4   :  { %1054 = vmax.xlane.f32.xlu2 %v1053_v5 }
 0x6ea   :  { %v1176_v23 = vpop.f32.mrf.mxu1 }
 0x6eb   :  { %v1179_v42 = vsel %vm330_vm8, %v1176_v23, -inf }
 0x6ec   :  { %1180 = vmax.xlane.f32.xlu0 %v1179_v42 }
 0x6fc   :  { %756 = vrot.lane.b32.xlu2 %v2011_v9, %s1785_s16 }
 0x700   :  { %v673_v39 = vpop.f32.mrf.mxu3 }
 0x701   :  { %v676_v37 = vadd.f32 %v673_v39, %v556_v8 }
 0x710   :  { %v948_v6 = vpop.f32.mrf.mxu3 }
 0x711   :  { %v2178_v43 = vadd.f32 %v1972_v62, %v948_v6  ;;  %v2193_v62 = vpop.permute.xlu1 %758 }
 0x712   :  { %1468 = vmatpush.xpose.msk.msrb.mxu2 %vm330_vm8, %v2193_v62 }
 0x713   :  { %1078 = vrot.lane.b32.xlu0 %v2178_v43, %s1784_s15  ;;  %1203 = vrot.lane.b32.xlu2 %v2178_v43, %s1783_s14 }
 0x714   :  { %1019 = vmatpush.msra.mxu0 %v2178_v43 }
 0x716   :  { %1497 = vmatpush.xpose.msk.msrb.mxu0 %vm330_vm8, %v2021_v35 }
 0x71a   :  { %1498 = vmatpush.xpose.msk.msrb.mxu0 %vm330_vm8, %v2007_v55 }
 0x71e   :  { %1499 = vmatpush.xpose.msk.msrb.mxu0 %vm330_vm8, %v2034_v1 }
 0x722   :  { %1500 = vmatpush.xpose.msk.msrb.mxu0 %vm330_vm8, %v2011_v9 }
 0x757   :  { %v1055_v14 = vpop.xlane.xlu2 %1054 }
 0x758   :  { %v1056_v15 = vsub.f32 %v1050_v2, %v1055_v14 }
 0x75a   :  { %v1057_v16 = vmul.f32 1.442695, %v1056_v15 }
 0x75c   :  { %1553 = vpow2.f32 %v1057_v16 }
 0x75f   :  { %v1181_v17 = vpop.xlane.xlu0 %1180  ;;  %v2197_v35 = vpop.permute.xlu2 %756 }
 0x760   :  { %v1182_v18 = vsub.f32 %v1176_v23, %v1181_v17  ;;  %1469 = vmatpush.xpose.msk.msrb.mxu2 %vm330_vm8, %v2197_v35 }
 0x762   :  { %v1554_v55 = vpop.eup %1553  ;;  %v1183_v9 = vmul.f32 1.442695, %v1182_v18 }
 0x763   :  { %1470 = vmatmul.msk.f32.vlgmr.msrb.gmra.mxu2 %vm330_vm8, %v2115_v3  ;;  %v1059_v1 = vsel %vm330_vm8, %v1554_v55, 0.0 }
 0x764   :  { %1486 = vmatpush.xpose.msk.msra.mxu2 %vm330_vm8, %v2122_v61  ;;  %1555 = vpow2.f32 %v1183_v9  ;;  %1060 = vadd.xlane.f32.xlu1 %v1059_v1 }
 0x76a   :  { %v2206_v19 = vpop.eup %1555 }
 0x76b   :  { %1487 = vmatmul.msk.f32.vlgmr.msra.gmra.mxu2 %vm330_vm8, %v2103_v40  ;;  %v1185_v20 = vsel %vm330_vm8, %v2206_v19, 0.0 }
 0x76c   :  { %1186 = vadd.xlane.f32.xlu0 %v1185_v20 }
 0x76d   :  { %v1204_v21 = vpop.permute.xlu2 %1203 }
 0x77d   :  { %1254 = vrot.lane.b32.xlu1 %v2103_v40, %s1785_s16 }
 0x780   :  { %1256 = vrot.lane.b32.xlu0 %v2122_v61, %s1785_s16 }
 0x785   :  { %v1079_v22 = vpop.permute.xlu0 %1078 }
 0x786   :  { %1099 = vmatpush.msrb.mxu2 %v1079_v22 }
 0x788   :  { %1224 = vmatpush.msra.mxu2 %v1204_v21 }
 0x7d7   :  { %v1061_v25 = vpop.xlane.xlu1 %1060 }
 0x7d8   :  { %1557 = vrcp.f32 %v1061_v25  ;;  %v1073_v32 = vand.u32 2147483648, %v1061_v25  ;;  %v1071_v34 = vand.u32 2147483647, %v1061_v25  ;;  %vm1067_vm3 = vweird.f32 %v1061_v25 }
 0x7da   :  { %v1074_v45 = vor.u32 1.1754944e-38, %v1073_v32  ;;  %vm1072_vm5 = vcmp.eq.f32.partialorder %v1071_v34, 8.507059e+37 }
 0x7de   :  { %v1558_v26 = vpop.eup %1557 }
 0x7df   :  { %v1063_v28 = vmul.f32 %v1558_v26, %v1061_v25  ;;  %v1187_v29 = vpop.xlane.xlu0 %1186  ;;  %vm1068_vm0 = vweird.f32 %v1558_v26 }
 0x7e0   :  { %1559 = vrcp.f32 %v1187_v29  ;;  %vm1069_vm4 = vmor %vm1067_vm3, %vm1068_vm0  ;;  %v1197_v54 = vand.u32 2147483647, %v1187_v29  ;;  %v1199_v57 = vand.u32 2147483648, %v1187_v29  ;;  %vm1193_vm10 = vweird.f32 %v1187_v29 }
 0x7e1   :  { %v1064_v30 = vsub.f32 1.0, %v1063_v28 }
 0x7e2   :  { %v1200_v61 = vor.u32 1.1754944e-38, %v1199_v57  ;;  %vm1198_vm12 = vcmp.eq.f32.partialorder %v1197_v54, 8.507059e+37 }
 0x7e3   :  { %v1065_v33 = vmul.f32 %v1558_v26, %v1064_v30 }
 0x7e5   :  { %v1066_v38 = vadd.f32 %v1558_v26, %v1065_v33 }
 0x7e6   :  { %v1560_v44 = vpop.eup %1559  ;;  %v792_v46 = vpop.f32.mrf.mxu2 }
 0x7e7   :  { %v1070_v47 = vsel %vm1069_vm4, %v1558_v26, %v1066_v38  ;;  %v1189_v48 = vmul.f32 %v1560_v44, %v1187_v29  ;;  %v795_v49 = vadd.f32 %v792_v46, %v676_v37  ;;  %vm1194_vm9 = vweird.f32 %v1560_v44 }
 0x7e8   :  { %v1075_v50 = vsel %vm1072_vm5, %v1074_v45, %v1070_v47  ;;  %vm1195_vm11 = vmor %vm1193_vm10, %vm1194_vm9 }
 0x7e9   :  { %v1190_v51 = vsub.f32 1.0, %v1189_v48  ;;  %v800_v52 = vadd.f32 %v2220_v41, %v795_v49  ;;  %v2223_v53 = vmul.f32 %v1554_v55, %v1075_v50 }
 0x7eb   :  { %v1191_v0 = vmul.f32 %v1560_v44, %v1190_v51  ;;  %v802_v59 = vrot.slane %v800_v52, 1  ;;  %v803_v60 = vrot.slane %v800_v52, 2  ;;  %v804_v40 = vrot.slane %v800_v52, 3  ;;  %817 = vst.msk [vmem:[#allocation13] sm:$0x1] %vm816_vm6, %v800_v52  ;;  %1491 = vmatmul.msk.f32.vlgmr.msrb.gmra.mxu2 %vm330_vm8, %v2223_v53 }
 0x7ec   :  { %v805_v31 = vrot.slane %v800_v52, 4  ;;  %v806_v58 = vrot.slane %v800_v52, 5  ;;  %v807_v7 = vrot.slane %v800_v52, 6  ;;  %v808_v63 = vrot.slane %v800_v52, 7 }
 0x7ed   :  { %v1192_v3 = vadd.f32 %v1560_v44, %v1191_v0  ;;  %818 = vst.msk [vmem:[#allocation13 + $0x2] sm:$0x1] %vm816_vm6, %v802_v59 }
 0x7ee   :  { %819 = vst.msk [vmem:[#allocation13 + $0x4] sm:$0x1] %vm816_vm6, %v803_v60  ;;  %v974_v24 = vpop.f32.mrf.mxu2 }
 0x7ef   :  { %v1196_v56 = vsel %vm1195_vm11, %v1560_v44, %v1192_v3  ;;  %820 = vst.msk [vmem:[#allocation13 + $0x6] sm:$0x1] %vm816_vm6, %v804_v40  ;;  %v977_v10 = vsel %vm330_vm8, %v974_v24, -inf  ;;  %v1255_v2 = vpop.permute.xlu1 %1254 }
 0x7f0   :  { %v1201_v11 = vsel %vm1198_vm12, %v1200_v61, %v1196_v56  ;;  %821 = vst.msk [vmem:[#allocation13 + $0x8] sm:$0x1] %vm816_vm6, %v805_v31  ;;  %978 = vmax.xlane.f32.xlu2 %v977_v10 }
 0x7f1   :  { %822 = vst.msk [vmem:[#allocation13 + $0xa] sm:$0x1] %vm816_vm6, %v806_v58  ;;  %v2235_v12 = vmul.f32 %v2206_v19, %v1201_v11 }
 0x7f2   :  { %823 = vst.msk [vmem:[#allocation13 + $0xc] sm:$0x1] %vm816_vm6, %v807_v7  ;;  %v1257_v13 = vpop.permute.xlu0 %1256 }
 0x7f3   :  { %824 = vst.msk [vmem:[#allocation13 + $0xe] sm:$0x1] %vm816_vm6, %v808_v63  ;;  %1504 = vmatmul.msk.f32.vlgmr.msra.gmra.mxu2 %vm330_vm8, %v2235_v12 }
 0x7f4   :  { %1510 = vmatpush.xpose.msk.msrb.mxu2 %vm330_vm8, %v1257_v13 }
 0x7fb   :  { %1511 = vmatmul.msk.f32.vlgmr.msrb.gmra.mxu2 %vm330_vm8, %v1255_v2 }
 0x863   :  { %v979_v5 = vpop.xlane.xlu2 %978 }
 0x864   :  { %v980_v23 = vsub.f32 %v974_v24, %v979_v5 }
 0x866   :  { %v981_v42 = vmul.f32 1.442695, %v980_v23 }
 0x868   :  { %1561 = vpow2.f32 %v981_v42 }
 0x86e   :  { %v1562_v39 = vpop.eup %1561  ;;  %v1101_v6 = vpop.f32.mrf.mxu2 }
 0x86f   :  { %1496 = vmatmul.msk.f32.vlgmr.msra.gmra.mxu3 %vm330_vm8, %v1101_v6  ;;  %v983_v14 = vsel %vm330_vm8, %v1562_v39, 0.0 }
 0x870   :  { %984 = vadd.xlane.f32.xlu1 %v983_v14 }
 0x876   :  { %v1226_v15 = vpop.f32.mrf.mxu2 }
 0x877   :  { %1509 = vmatmul.msk.f32.vlgmr.msra.gmra.mxu1 %vm330_vm8, %v1226_v15 }
 0x87e   :  { %v1279_v16 = vpop.f32.mrf.mxu2 }
 0x87f   :  { %v1282_v17 = vsel %vm330_vm8, %v1279_v16, -inf }
 0x880   :  { %1283 = vmax.xlane.f32.xlu0 %v1282_v17 }
 0x894   :  { %1306 = vrot.lane.b32.xlu0 %v2178_v43, %s1785_s16 }
 0x8e3   :  { %v985_v18 = vpop.xlane.xlu1 %984 }
 0x8e4   :  { %1563 = vrcp.f32 %v985_v18  ;;  %v997_v19 = vand.u32 2147483648, %v985_v18  ;;  %v995_v21 = vand.u32 2147483647, %v985_v18  ;;  %vm991_vm13 = vweird.f32 %v985_v18 }
 0x8e6   :  { %v998_v25 = vor.u32 1.1754944e-38, %v997_v19  ;;  %vm996_vm14 = vcmp.eq.f32.partialorder %v995_v21, 8.507059e+37 }
 0x8ea   :  { %v1564_v55 = vpop.eup %1563 }
 0x8eb   :  { %v987_v9 = vmul.f32 %v1564_v55, %v985_v18  ;;  %vm992_vm7 = vweird.f32 %v1564_v55 }
 0x8ec   :  { %vm993_vm1 = vmor %vm991_vm13, %vm992_vm7 }
 0x8ed   :  { %v988_v1 = vsub.f32 1.0, %v987_v9 }
 0x8ef   :  { %v989_v20 = vmul.f32 %v1564_v55, %v988_v1 }
 0x8f1   :  { %v990_v22 = vadd.f32 %v1564_v55, %v989_v20 }
 0x8f2   :  { %v1124_v57 = vpop.f32.mrf.mxu3 }
 0x8f3   :  { %v994_v26 = vsel %vm993_vm1, %v1564_v55, %v990_v22  ;;  %v1284_v27 = vpop.xlane.xlu0 %1283 }
 0x8f4   :  { %v999_v28 = vsel %vm996_vm14, %v998_v25, %v994_v26  ;;  %v1285_v29 = vsub.f32 %v1279_v16, %v1284_v27  ;;  %v1249_v60 = vpop.f32.mrf.mxu1 }
 0x8f5   :  { %v1000_v30 = vmul.f32 %v1562_v39, %v999_v28 }
 0x8f6   :  { %v1286_v43 = vmul.f32 1.442695, %v1285_v29 }
 0x8f7   :  { %1488 = vmatmul.msk.f32.vlgmr.msra.gmra.mxu0 %vm330_vm8, %v1000_v30 }
 0x8f8   :  { %1565 = vpow2.f32 %v1286_v43  ;;  %1513 = vmatpush.xpose.msk.msra.mxu0 %vm330_vm8, %v2167_v4 }
 0x8fc   :  { %1514 = vmatpush.xpose.msk.msra.mxu0 %vm330_vm8, %v2171_v36 }
 0x8fe   :  { %v1566_v32 = vpop.eup %1565 }
 0x8ff   :  { %v1288_v8 = vsel %vm330_vm8, %v1566_v32, 0.0 }
 0x900   :  { %1515 = vmatpush.xpose.msk.msra.mxu0 %vm330_vm8, %v2193_v62  ;;  %1289 = vadd.xlane.f32.xlu2 %v1288_v8  ;;  %v1150_v62 = vadd.f32 %v2223_v53, %v1000_v30 }
 0x902   :  { %v1253_v51 = vadd.f32 %v2235_v12, %v1150_v62 }
 0x904   :  { %1516 = vmatpush.xpose.msk.msra.mxu0 %vm330_vm8, %v2197_v35 }
 0x906   :  { %v1307_v33 = vpop.permute.xlu0 %1306 }
 0x907   :  { %1327 = vmatpush.msrb.mxu3 %v1307_v33 }
 0x973   :  { %v1290_v34 = vpop.xlane.xlu2 %1289 }
 0x974   :  { %1567 = vrcp.f32 %v1290_v34  ;;  %v1021_v37 = vpop.f32.mrf.mxu0  ;;  %v1302_v44 = vand.u32 2147483648, %v1290_v34  ;;  %v1300_v46 = vand.u32 2147483647, %v1290_v34  ;;  %vm1296_vm2 = vweird.f32 %v1290_v34 }
 0x975   :  { %1501 = vmatmul.msk.f32.vlgmr.msrb.gmra.mxu0 %vm330_vm8, %v1021_v37 }
 0x976   :  { %v1303_v35 = vor.u32 1.1754944e-38, %v1302_v44  ;;  %vm1301_vm3 = vcmp.eq.f32.partialorder %v1300_v46, 8.507059e+37 }
 0x97a   :  { %v1568_v4 = vpop.eup %1567 }
 0x97b   :  { %v1292_v38 = vmul.f32 %v1568_v4, %v1290_v34  ;;  %vm1297_vm15 = vweird.f32 %v1568_v4 }
 0x97c   :  { %vm1298_vm0 = vmor %vm1296_vm2, %vm1297_vm15 }
 0x97d   :  { %v1293_v36 = vsub.f32 1.0, %v1292_v38 }
 0x97f   :  { %v1294_v45 = vmul.f32 %v1568_v4, %v1293_v36 }
 0x981   :  { %v1295_v47 = vadd.f32 %v1568_v4, %v1294_v45 }
 0x983   :  { %v1299_v48 = vsel %vm1298_vm0, %v1568_v4, %v1295_v47 }
 0x984   :  { %v1304_v49 = vsel %vm1301_vm3, %v1303_v35, %v1299_v48 }
 0x985   :  { %v1305_v50 = vmul.f32 %v1566_v32, %v1304_v49 }
 0x987   :  { %1512 = vmatmul.msk.f32.vlgmr.msrb.gmra.mxu3 %vm330_vm8, %v1305_v50  ;;  %v1356_v52 = vadd.f32 %v1305_v50, %v1253_v51 }
 0x989   :  { %v1381_v54 = vmul.f32 0.25, %v1356_v52 }
 0x98b   :  { %1383 = vst.msk [vmem:[#allocation14 + $0x8] sm:$0xff] %vm330_vm8, %v1381_v54 }
 0x98c   :  { %1409 = dma.vmem_to_hbm [thread:$0]  %s1402_s17, 256, %s1404_s19, [#allocation15], %s1777_s12, %s1777_s12, %s1778_s13  }
 0x98d   :  { %s1388_s12 = sshll.u32 %s1787_s11, 4  ;;  %s1389_s12 = int_to_ptr.vmem [resolvable:$true] %s1388_s12 }
 0x9f2   :  { %v1147_v53 = vpop.f32.mrf.mxu0 }
 0x9f3   :  { %v1148_v59 = vadd.f32 %v1147_v53, %v1124_v57 }
 0x9f5   :  { %v1252_v40 = vadd.f32 %v1249_v60, %v1148_v59 }
 0xa0a   :  { %v1329_v0 = vpop.f32.mrf.mxu3 }
 0xa0b   :  { %1517 = vmatmul.msk.f32.vlgmr.msra.gmra.mxu0 %vm330_vm8, %v1329_v0 }
 0xa88   :  { %v1352_v31 = vpop.f32.mrf.mxu0 }
 0xa89   :  { %v1355_v3 = vadd.f32 %v1352_v31, %v1252_v40 }
 0xa8b   :  { %v1357_v58 = vadd.f32 %v2220_v41, %v1355_v3 }
 0xa8d   :  { %v1359_v61 = vrot.slane %v1357_v58, 1  ;;  %v1360_v7 = vrot.slane %v1357_v58, 2  ;;  %v1361_v24 = vrot.slane %v1357_v58, 3  ;;  %1373 = vst.msk [vmem:[#allocation13 + $0x1] sm:$0x1] %vm816_vm6, %v1357_v58  ;;  %v1362_v56 = vrot.slane %v1357_v58, 4 }
 0xa8e   :  { %v1363_v63 = vrot.slane %v1357_v58, 5  ;;  %v1364_v10 = vrot.slane %v1357_v58, 6  ;;  %v1365_v11 = vrot.slane %v1357_v58, 7 }
 0xa8f   :  { %1374 = vst.msk [vmem:[#allocation13 + $0x3] sm:$0x1] %vm816_vm6, %v1359_v61 }
 0xa90   :  { %1375 = vst.msk [vmem:[#allocation13 + $0x5] sm:$0x1] %vm816_vm6, %v1360_v7 }
 0xa91   :  { %1376 = vst.msk [vmem:[#allocation13 + $0x7] sm:$0x1] %vm816_vm6, %v1361_v24 }
 0xa92   :  { %1377 = vst.msk [vmem:[#allocation13 + $0x9] sm:$0x1] %vm816_vm6, %v1362_v56 }
 0xa93   :  { %1378 = vst.msk [vmem:[#allocation13 + $0xb] sm:$0x1] %vm816_vm6, %v1363_v63 }
 0xa94   :  { %1379 = vst.msk [vmem:[#allocation13 + $0xd] sm:$0x1] %vm816_vm6, %v1364_v10 }
 0xa95   :  { %1380 = vst.msk [vmem:[#allocation13 + $0xf] sm:$0x1] %vm816_vm6, %v1365_v11 }
 0xa96   :  { %1396 = dma.vmem_to_hbm [thread:$0]  %s1389_s12, 256, %s1391_s21, [#allocation4], %s1774_s22, %s1774_s22, %s1775_s23  }
 0xa97   :  { %1769 = dma.done.wait [#allocation4], 256  }
 0xa98   :  { %1770 = vsyncadd [#allocation4], 4294967040 }
 0xa99   :  { %1771 = dma.done.wait [#allocation15], 256  }
 0xa9a   :  { %1772 = vsyncadd [#allocation15], 4294967040 }
 0xa9b   :  { %1418 = vsyncpa [#allocation3], 1 }
 0xa9c   :  { %1419 = vsyncpa [#allocation6], 1 }
 0xa9d   :  { %1420 = vsyncpa [#allocation9], 1 }
 0xa9e   :  { %1421 = vsyncpa [#allocation12], 1 }
 0xa9f   :  { %1422 = vsyncpa [#allocation4], 1 }
 0xaa0   :  { %1423 = vsyncpa [#allocation15], 1 }

</bundles_post_ra>
